<compile_context>
chip_gen: v6e
topology: v6e:2x2x1
jax: 0.10.0
libtpu: 0.0.40
codegen_flags: <defaults>
</compile_context>

<pallas_src>
import functools

import jax
import jax.numpy as jnp
from jax.experimental import pallas as pl
from jax.experimental.pallas import tpu as pltpu


def _vmem_limit_bytes():
    # Generation-aware VMEM budget: v5e/v6e have 128 MiB/TC, v7x only 64 MiB.
    # Use ~3/4 of capacity (capped at 100 MiB) and leave headroom for compiler
    # internal scratch + double-buffered DMA windows.
    fallback = 64 * 1024 * 1024
    try:
        info = pltpu.get_tpu_info()
        cap = getattr(info, "vmem_capacity_bytes", None) or fallback
    except Exception:
        cap = fallback
    return min(int(cap * 3 // 4), 100 * 1024 * 1024)


_VMEM_LIMIT = _vmem_limit_bytes()


def _compiler_params(dimension_semantics):
    return pltpu.CompilerParams(
        dimension_semantics=dimension_semantics,
        vmem_limit_bytes=_VMEM_LIMIT,
    )


def _pick_tile(dim, pref, floor=8):
    """Largest power-of-two fraction of `pref` that divides `dim`, else the
    full dim (a full-extent block is always layout-legal)."""
    # TODO(synk): pad-to-tile + masked tails for ragged/long sequence lengths
    # instead of the full-dim fallback (avoids the perf cliff / VMEM blowup).
    if dim <= pref:
        return dim
    t = pref
    while t >= floor:
        if dim % t == 0:
            return t
        t //= 2
    return dim


# ---------------------------------------------------------------------------
# Kernel 1: fused QKV projection.
#   x2d (M, D) @ wqkv (D, 3*H*Hd) + bqkv, K-tiled over D with an fp32 VMEM
#   accumulator; the final step splits the accumulator into three lane-dense
#   q/k/v outputs (so no head/transpose shuffling is needed downstream).
# ---------------------------------------------------------------------------
def _qkv_proj_kernel(x_ref, w_ref, b_ref, q_ref, k_ref, v_ref, acc_ref, *, hhd):
    k_step = pl.program_id(1)

    @pl.when(k_step == 0)
    def _():
        acc_ref[...] = jnp.zeros(acc_ref.shape, acc_ref.dtype)

    acc_ref[...] += jnp.dot(
        x_ref[...], w_ref[...], preferred_element_type=jnp.float32
    )

    @pl.when(k_step == pl.num_programs(1) - 1)
    def _():
        y = acc_ref[...] + b_ref[...]            # bias added in fp32
        q_ref[...] = y[:, :hhd].astype(q_ref.dtype)
        k_ref[...] = y[:, hhd:2 * hhd].astype(k_ref.dtype)
        v_ref[...] = y[:, 2 * hhd:].astype(v_ref.dtype)


def _qkv_projection(x2d, wqkv, bqkv, *, hhd, out_dtype, tm_pref=256, tk_pref=512):
    M, D = x2d.shape
    three_hhd = wqkv.shape[1]                    # 3*H*Hd (<= a few K for ViT)
    tm = _pick_tile(M, tm_pref)
    tk = _pick_tile(D, tk_pref)

    out_sds = jax.ShapeDtypeStruct((M, hhd), out_dtype)
    qkv_out_spec = pl.BlockSpec((tm, hhd), lambda i, k: (i, 0))

    return pl.pallas_call(
        functools.partial(_qkv_proj_kernel, hhd=hhd),
        out_shape=(out_sds, out_sds, out_sds),
        grid=(M // tm, D // tk),
        in_specs=[
            pl.BlockSpec((tm, tk), lambda i, k: (i, k)),          # x tile
            pl.BlockSpec((tk, three_hhd), lambda i, k: (k, 0)),   # weight panel
            pl.BlockSpec((1, three_hhd), lambda i, k: (0, 0)),    # bias (resident)
        ],
        out_specs=(qkv_out_spec, qkv_out_spec, qkv_out_spec),
        scratch_shapes=[pltpu.VMEM((tm, three_hhd), jnp.float32)],
        compiler_params=_compiler_params(("parallel", "arbitrary")),
    )(x2d, wqkv, bqkv)


# ---------------------------------------------------------------------------
# Kernel 2: flash-style attention, ALL heads per grid step.
#   q, k, v: (B, N, H*Hd), already scaled by head_dim**-0.5 (folded into wq).
#   Grid (B, Nq_tiles, Nk_tiles); online softmax with per-head fp32 (m, l, acc)
#   scratch; each head is a *static* lane slice of the resident (t, H*Hd) tile,
#   so no transposes and a single lane-dense (tq, H*Hd) output store.
# ---------------------------------------------------------------------------
def _flash_attn_kernel(q_ref, k_ref, v_ref, o_ref, m_sc, l_sc, acc_sc,
                       *, heads, head_dim, approx_recip):
    ki = pl.program_id(2)

    @pl.when(ki == 0)
    def _():
        m_sc[...] = jnp.full(m_sc.shape, -jnp.inf, m_sc.dtype)
        l_sc[...] = jnp.zeros(l_sc.shape, l_sc.dtype)
        acc_sc[...] = jnp.zeros(acc_sc.shape, acc_sc.dtype)

    for h in range(heads):                      # static unroll over heads
        lo = h * head_dim
        q = q_ref[:, lo:lo + head_dim]          # (tq, Hd) bf16, pre-scaled
        k = k_ref[:, lo:lo + head_dim]          # (tk, Hd) bf16
        v = v_ref[:, lo:lo + head_dim]          # (tk, Hd) bf16

        # q @ k^T without materializing a transpose: contract the last axes.
        s = jax.lax.dot_general(
            q, k, (((1,), (1,)), ((), ())), preferred_element_type=jnp.float32
        )                                       # (tq, tk) fp32 scores

        m_prev = m_sc[h]                                            # (tq, 1)
        m_new = jnp.maximum(m_prev, jnp.max(s, axis=-1, keepdims=True))
        alpha = jnp.exp(m_prev - m_new)
        p = jnp.exp(s - m_new)                                      # fp32
        l_sc[h] = alpha * l_sc[h] + jnp.sum(p, axis=-1, keepdims=True)
        acc_sc[h] = alpha * acc_sc[h] + jnp.dot(
            p.astype(v.dtype), v, preferred_element_type=jnp.float32
        )
        m_sc[h] = m_new

    @pl.when(ki == pl.num_programs(2) - 1)
    def _():
        ctx = []
        for h in range(heads):
            if approx_recip:
                inv = pl.reciprocal(l_sc[h], approx=True)   # EUP, inference
            else:
                inv = 1.0 / l_sc[h]                          # exact (parity)
            ctx.append(acc_sc[h] * inv)
        # One lane-dense (tq, H*Hd) store instead of H masked Hd-wide stores.
        o_ref[...] = jnp.concatenate(ctx, axis=-1).astype(o_ref.dtype)


def _flash_attention(q, k, v, *, heads, head_dim, approx_recip=False,
                     tq_pref=256, tk_pref=512):
    B, N, HHd = q.shape
    tq = _pick_tile(N, tq_pref)
    tk = _pick_tile(N, tk_pref)

    q_spec = pl.BlockSpec((None, tq, HHd), lambda b, qi, ki: (b, qi, 0))
    # On v5e, if profiling shows exposed K/V DMA, add
    # pipeline_mode=pl.Buffered(3) to kv_spec.
    kv_spec = pl.BlockSpec((None, tk, HHd), lambda b, qi, ki: (b, ki, 0))
    o_spec = pl.BlockSpec((None, tq, HHd), lambda b, qi, ki: (b, qi, 0))

    return pl.pallas_call(
        functools.partial(_flash_attn_kernel, heads=heads, head_dim=head_dim,
                          approx_recip=approx_recip),
        out_shape=jax.ShapeDtypeStruct((B, N, HHd), q.dtype),
        grid=(B, N // tq, N // tk),
        in_specs=[q_spec, kv_spec, kv_spec],
        out_specs=o_spec,
        scratch_shapes=[
            pltpu.VMEM((heads, tq, 1), jnp.float32),          # running max
            pltpu.VMEM((heads, tq, 1), jnp.float32),          # running denom
            pltpu.VMEM((heads, tq, head_dim), jnp.float32),   # running context
        ],
        compiler_params=_compiler_params(("parallel", "parallel", "arbitrary")),
    )(q, k, v)


# ---------------------------------------------------------------------------
# Kernel 3: out projection — tiled matmul + bias with K-tiling / fp32 acc.
# ---------------------------------------------------------------------------
def _matmul_bias_kernel(x_ref, w_ref, b_ref, o_ref, acc_ref):
    k_step = pl.program_id(2)

    @pl.when(k_step == 0)
    def _():
        acc_ref[...] = jnp.zeros(acc_ref.shape, acc_ref.dtype)

    acc_ref[...] += jnp.dot(
        x_ref[...], w_ref[...], preferred_element_type=jnp.float32
    )

    @pl.when(k_step == pl.num_programs(2) - 1)
    def _():
        o_ref[...] = (acc_ref[...] + b_ref[...]).astype(o_ref.dtype)


def _matmul_bias(x, w, b, *, out_dtype, tm_pref=256, tn_pref=512, tk_pref=512):
    M, K = x.shape
    _, N = w.shape
    tm = _pick_tile(M, tm_pref)
    tn = _pick_tile(N, tn_pref, floor=128)
    tk = _pick_tile(K, tk_pref)
    return pl.pallas_call(
        _matmul_bias_kernel,
        out_shape=jax.ShapeDtypeStruct((M, N), out_dtype),
        grid=(M // tm, N // tn, K // tk),
        in_specs=[
            pl.BlockSpec((tm, tk), lambda i, j, k: (i, k)),
            pl.BlockSpec((tk, tn), lambda i, j, k: (k, j)),
            pl.BlockSpec((1, tn), lambda i, j, k: (0, j)),
        ],
        out_specs=pl.BlockSpec((tm, tn), lambda i, j, k: (i, j)),
        scratch_shapes=[pltpu.VMEM((tm, tn), jnp.float32)],
        compiler_params=_compiler_params(("parallel", "parallel", "arbitrary")),
    )(x, w, b)


# ---------------------------------------------------------------------------
# Wrapper: full SelfAttention forward (no transposes, bf16 MXU, fp32 output).
# ---------------------------------------------------------------------------
def self_attention_pallas(x, fused, *, heads, head_dim,
                          compute_dtype=jnp.bfloat16, approx_recip=False):
    """x: (B, N, D) float32.  fused: output of prepare_params() (hoisted)."""
    B, N, D = x.shape
    HHd = heads * head_dim

    x2d = x.astype(compute_dtype).reshape(B * N, D)

    q2d, k2d, v2d = _qkv_projection(
        x2d, fused["wqkv"], fused["bqkv"], hhd=HHd, out_dtype=compute_dtype
    )
    # Free metadata reshapes only — no head transposes anywhere.
    q = q2d.reshape(B, N, HHd)
    k = k2d.reshape(B, N, HHd)
    v = v2d.reshape(B, N, HHd)

    ctx = _flash_attention(q, k, v, heads=heads, head_dim=head_dim,
                           approx_recip=approx_recip)                # (B, N, HHd)
    ctx2d = ctx.reshape(B * N, HHd)

    out = _matmul_bias(ctx2d, fused["wo"], fused["bo"], out_dtype=x.dtype)
    return out.reshape(B, N, D)


# ---------------------------------------------------------------------------
# Parameters
# ---------------------------------------------------------------------------
def make_params(key, in_dim, heads, head_dim):
    """Module-structured parameters (LinearGeneral shapes).  randn scaled by
    fan-in**-0.5 so activations/scores are O(1) and the bf16-kernel vs fp32
    reference comparison is well conditioned."""
    kq, kk, kv, ko = jax.random.split(key, 4)
    s_in = in_dim ** -0.5
    s_out = (heads * head_dim) ** -0.5
    return {
        "wq": jax.random.normal(kq, (in_dim, heads, head_dim), jnp.float32) * s_in,
        "wk": jax.random.normal(kk, (in_dim, heads, head_dim), jnp.float32) * s_in,
        "wv": jax.random.normal(kv, (in_dim, heads, head_dim), jnp.float32) * s_in,
        "wo": jax.random.normal(ko, (heads, head_dim, in_dim), jnp.float32) * s_out,
        "bq": jnp.zeros((heads, head_dim), jnp.float32),
        "bk": jnp.zeros((heads, head_dim), jnp.float32),
        "bv": jnp.zeros((heads, head_dim), jnp.float32),
        "bo": jnp.zeros((in_dim,), jnp.float32),
    }


def prepare_params(params, *, heads, head_dim, compute_dtype=jnp.bfloat16):
    """Hoisted weight prep — done ONCE, not per forward call: fuse q/k/v into
    one (D, 3*H*Hd) matrix, fold 1/sqrt(head_dim) into the Q weights/bias,
    flatten the out projection, cast MXU operands to bf16 (biases stay fp32)."""
    in_dim = params["wq"].shape[0]
    hhd = heads * head_dim
    scale_inv = jnp.float32(head_dim) ** -0.5
    wq = params["wq"].reshape(in_dim, hhd) * scale_inv
    wk = params["wk"].reshape(in_dim, hhd)
    wv = params["wv"].reshape(in_dim, hhd)
    bq = params["bq"].reshape(1, hhd) * scale_inv
    bk = params["bk"].reshape(1, hhd)
    bv = params["bv"].reshape(1, hhd)
    return {
        "wqkv": jnp.concatenate([wq, wk, wv], axis=-1).astype(compute_dtype),
        "bqkv": jnp.concatenate([bq, bk, bv], axis=-1).astype(jnp.float32),
        "wo": params["wo"].reshape(hhd, in_dim).astype(compute_dtype),
        "bo": params["bo"].reshape(1, in_dim).astype(jnp.float32),
    }


def self_attention_reference(x, params, *, heads, head_dim):
    """Pure-JAX fp32 port of the PyTorch forward (HIGHEST matmul precision)."""
    del heads  # implied by parameter shapes
    hp = jax.lax.Precision.HIGHEST
    scale = head_dim ** 0.5
    q = jnp.tensordot(x, params["wq"], axes=([2], [0]), precision=hp) + params["bq"]
    k = jnp.tensordot(x, params["wk"], axes=([2], [0]), precision=hp) + params["bk"]
    v = jnp.tensordot(x, params["wv"], axes=([2], [0]), precision=hp) + params["bv"]
    q = q.transpose(0, 2, 1, 3)                     # (B, H, N, Hd)
    k = k.transpose(0, 2, 1, 3)
    v = v.transpose(0, 2, 1, 3)
    s = jnp.einsum("bhqd,bhkd->bhqk", q, k, precision=hp) / scale
    attn = jax.nn.softmax(s, axis=-1)
    out = jnp.einsum("bhqk,bhkd->bhqd", attn, v, precision=hp)
    out = out.transpose(0, 2, 1, 3)                 # (B, N, H, Hd)
    out = jnp.tensordot(out, params["wo"], axes=([2, 3], [0, 1]), precision=hp)
    return out + params["bo"]


if __name__ == "__main__":
    # Small shapes consistent with the module: batch=2, seq=8, in_dim=32, heads=4.
    B, N, D, heads = 2, 8, 32, 4
    head_dim = D // heads                            # 8

    key = jax.random.PRNGKey(0)
    kx, kp = jax.random.split(key)
    x = jax.random.normal(kx, (B, N, D), jnp.float32)
    params = make_params(kp, D, heads, head_dim)
    fused = prepare_params(params, heads=heads, head_dim=head_dim)  # hoisted once

    fwd = jax.jit(functools.partial(self_attention_pallas,
                                    heads=heads, head_dim=head_dim))
    out = jax.block_until_ready(fwd(x, fused))

    # Reference: fp32 math on the bf16-quantized inputs the kernel actually
    # consumes (isolates kernel error from input quantization).  The kernel's
    # MXU runs in bf16 with fp32 accumulation, so the tolerance reflects bf16.
    q32 = lambda a: a.astype(jnp.bfloat16).astype(jnp.float32)
    ref = self_attention_reference(q32(x), jax.tree.map(q32, params),
                                   heads=heads, head_dim=head_dim)

    assert out.shape == (B, N, D)
    assert jnp.allclose(out, ref, atol=6e-2, rtol=6e-2), \
        f"max abs err {float(jnp.max(jnp.abs(out - ref)))}"
    print("KERNEL_OK")
</pallas_src>

<mosaic_0001>
module attributes {stable_mosaic.version = 11 : i64} {
  func.func @_qkv_proj_kernel(%arg0: i32, %arg1: i32, %arg2: memref<16x32xbf16, #tpu.memory_space<vmem>>, %arg3: memref<32x96xbf16, #tpu.memory_space<vmem>>, %arg4: memref<1x96xf32, #tpu.memory_space<vmem>>, %arg5: memref<16x32xbf16, #tpu.memory_space<vmem>>, %arg6: memref<16x32xbf16, #tpu.memory_space<vmem>>, %arg7: memref<16x32xbf16, #tpu.memory_space<vmem>>, %arg8: memref<16x96xf32, #tpu.memory_space<vmem>>) attributes {dimension_semantics = [#tpu.dimension_semantics<parallel>, #tpu.dimension_semantics<arbitrary>], iteration_bounds = array<i64: 1, 1>, scalar_prefetch = 0 : i64, scratch_operands = 1 : i64, tpu.core_type = #tpu.core_type<tc>, window_params = [{transform_indices = @transform_0, window_bounds = array<i64: 16, 32>}, {transform_indices = @transform_1, window_bounds = array<i64: 32, 96>}, {pipeline_mode = #tpu.pipeline_mode<synchronous>, transform_indices = @transform_2, window_bounds = array<i64: 1, 96>}, {transform_indices = @transform_3, window_bounds = array<i64: 16, 32>}, {transform_indices = @transform_4, window_bounds = array<i64: 16, 32>}, {transform_indices = @transform_5, window_bounds = array<i64: 16, 32>}]} {
    %c0_i32 = arith.constant 0 : i32
    %0 = arith.cmpi eq, %arg1, %c0_i32 : i32
    %1 = arith.extui %0 : i1 to i32
    %c0_i32_0 = arith.constant 0 : i32
    %2 = arith.cmpi ne, %1, %c0_i32_0 : i32
    scf.if %2 {
      %cst_10 = arith.constant 0.000000e+00 : f32
      %12 = vector.broadcast %cst_10 : f32 to vector<16x96xf32>
      %c0_11 = arith.constant 0 : index
      %c0_12 = arith.constant 0 : index
      %13 = vector.load %arg8[%c0_11, %c0_12] : memref<16x96xf32, #tpu.memory_space<vmem>>, vector<16x96xf32>
      tpu.vector_store %arg8[%c0_11, %c0_12], %12 {strides = array<i32>} : memref<16x96xf32, #tpu.memory_space<vmem>>, vector<16x96xf32>,
    } else {
    }
    %c0 = arith.constant 0 : index
    %c0_1 = arith.constant 0 : index
    %3 = vector.load %arg8[%c0, %c0_1] : memref<16x96xf32, #tpu.memory_space<vmem>>, vector<16x96xf32>
    %c0_2 = arith.constant 0 : index
    %c0_3 = arith.constant 0 : index
    %4 = vector.load %arg2[%c0_2, %c0_3] : memref<16x32xbf16, #tpu.memory_space<vmem>>, vector<16x32xbf16>
    %c0_4 = arith.constant 0 : index
    %c0_5 = arith.constant 0 : index
    %5 = vector.load %arg3[%c0_4, %c0_5] : memref<32x96xbf16, #tpu.memory_space<vmem>>, vector<32x96xbf16>
    %cst = arith.constant dense<0.000000e+00> : vector<16x96xf32>
    %6 = tpu.matmul %4, %5, %cst {dimension_numbers = #tpu.dot_dimension_numbers<[1], [0], [0], [1], [0, 0, 1, 1], [], []>} : vector<16x32xbf16>, vector<32x96xbf16>, vector<16x96xf32> -> vector<16x96xf32>
    %7 = arith.addf %3, %6 : vector<16x96xf32>
    %c0_6 = arith.constant 0 : index
    %c0_7 = arith.constant 0 : index
    %8 = vector.load %arg8[%c0_6, %c0_7] : memref<16x96xf32, #tpu.memory_space<vmem>>, vector<16x96xf32>
    tpu.vector_store %arg8[%c0_6, %c0_7], %7 {strides = array<i32>} : memref<16x96xf32, #tpu.memory_space<vmem>>, vector<16x96xf32>,
    %c0_i32_8 = arith.constant 0 : i32
    %9 = arith.cmpi eq, %arg1, %c0_i32_8 : i32
    %10 = arith.extui %9 : i1 to i32
    %c0_i32_9 = arith.constant 0 : i32
    %11 = arith.cmpi ne, %10, %c0_i32_9 : i32
    scf.if %11 {
      %c0_10 = arith.constant 0 : index
      %c0_11 = arith.constant 0 : index
      %12 = vector.load %arg8[%c0_10, %c0_11] : memref<16x96xf32, #tpu.memory_space<vmem>>, vector<16x96xf32>
      %c0_12 = arith.constant 0 : index
      %c0_13 = arith.constant 0 : index
      %13 = vector.load %arg4[%c0_12, %c0_13] : memref<1x96xf32, #tpu.memory_space<vmem>>, vector<1x96xf32>
      %14 = vector.broadcast %13 : vector<1x96xf32> to vector<16x96xf32>
      %15 = arith.addf %12, %14 : vector<16x96xf32>
      %16 = vector.extract_strided_slice %15 {offsets = [0, 0], sizes = [16, 32], strides = [1, 1]} : vector<16x96xf32> to vector<16x32xf32>
      %17 = arith.truncf %16 : vector<16x32xf32> to vector<16x32xbf16>
      %c0_14 = arith.constant 0 : index
      %c0_15 = arith.constant 0 : index
      %18 = vector.load %arg5[%c0_14, %c0_15] : memref<16x32xbf16, #tpu.memory_space<vmem>>, vector<16x32xbf16>
      tpu.vector_store %arg5[%c0_14, %c0_15], %17 {strides = array<i32>} : memref<16x32xbf16, #tpu.memory_space<vmem>>, vector<16x32xbf16>,
      %19 = vector.extract_strided_slice %15 {offsets = [0, 32], sizes = [16, 32], strides = [1, 1]} : vector<16x96xf32> to vector<16x32xf32>
      %20 = arith.truncf %19 : vector<16x32xf32> to vector<16x32xbf16>
      %c0_16 = arith.constant 0 : index
      %c0_17 = arith.constant 0 : index
      %21 = vector.load %arg6[%c0_16, %c0_17] : memref<16x32xbf16, #tpu.memory_space<vmem>>, vector<16x32xbf16>
      tpu.vector_store %arg6[%c0_16, %c0_17], %20 {strides = array<i32>} : memref<16x32xbf16, #tpu.memory_space<vmem>>, vector<16x32xbf16>,
      %22 = vector.extract_strided_slice %15 {offsets = [0, 64], sizes = [16, 32], strides = [1, 1]} : vector<16x96xf32> to vector<16x32xf32>
      %23 = arith.truncf %22 : vector<16x32xf32> to vector<16x32xbf16>
      %c0_18 = arith.constant 0 : index
      %c0_19 = arith.constant 0 : index
      %24 = vector.load %arg7[%c0_18, %c0_19] : memref<16x32xbf16, #tpu.memory_space<vmem>>, vector<16x32xbf16>
      tpu.vector_store %arg7[%c0_18, %c0_19], %23 {strides = array<i32>} : memref<16x32xbf16, #tpu.memory_space<vmem>>, vector<16x32xbf16>,
    } else {
    }
    return
  }
  func.func @transform_0(%arg0: i32, %arg1: i32) -> (i32, i32) {
    %c0_i32 = arith.constant 0 : i32
    return %arg0, %arg1 : i32, i32
  }
  func.func @transform_1(%arg0: i32, %arg1: i32) -> (i32, i32) {
    %c0_i32 = arith.constant 0 : i32
    %c0_i32_0 = arith.constant 0 : i32
    return %arg1, %c0_i32 : i32, i32
  }
  func.func @transform_2(%arg0: i32, %arg1: i32) -> (i32, i32) {
    %c0_i32 = arith.constant 0 : i32
    %c0_i32_0 = arith.constant 0 : i32
    %c0_i32_1 = arith.constant 0 : i32
    return %c0_i32, %c0_i32_0 : i32, i32
  }
  func.func @transform_3(%arg0: i32, %arg1: i32) -> (i32, i32) {
    %c0_i32 = arith.constant 0 : i32
    %c0_i32_0 = arith.constant 0 : i32
    return %arg0, %c0_i32 : i32, i32
  }
  func.func @transform_4(%arg0: i32, %arg1: i32) -> (i32, i32) {
    %c0_i32 = arith.constant 0 : i32
    %c0_i32_0 = arith.constant 0 : i32
    return %arg0, %c0_i32 : i32, i32
  }
  func.func @transform_5(%arg0: i32, %arg1: i32) -> (i32, i32) {
    %c0_i32 = arith.constant 0 : i32
    %c0_i32_0 = arith.constant 0 : i32
    return %arg0, %c0_i32 : i32, i32
  }
}

module attributes {stable_mosaic.version = 11 : i64} {
  func.func @_flash_attn_kernel(%arg0: i32, %arg1: i32, %arg2: i32, %arg3: memref<1x8x32xbf16, #tpu.memory_space<vmem>>, %arg4: memref<1x8x32xbf16, #tpu.memory_space<vmem>>, %arg5: memref<1x8x32xbf16, #tpu.memory_space<vmem>>, %arg6: memref<1x8x32xbf16, #tpu.memory_space<vmem>>, %arg7: memref<4x8x1xf32, #tpu.memory_space<vmem>>, %arg8: memref<4x8x1xf32, #tpu.memory_space<vmem>>, %arg9: memref<4x8x8xf32, #tpu.memory_space<vmem>>) attributes {dimension_semantics = [#tpu.dimension_semantics<parallel>, #tpu.dimension_semantics<parallel>, #tpu.dimension_semantics<arbitrary>], iteration_bounds = array<i64: 2, 1, 1>, scalar_prefetch = 0 : i64, scratch_operands = 3 : i64, tpu.core_type = #tpu.core_type<tc>, window_params = [{transform_indices = @transform_0, window_bounds = array<i64: 1, 8, 32>}, {transform_indices = @transform_1, window_bounds = array<i64: 1, 8, 32>}, {transform_indices = @transform_2, window_bounds = array<i64: 1, 8, 32>}, {transform_indices = @transform_3, window_bounds = array<i64: 1, 8, 32>}]} {
    %c0_i32 = arith.constant 0 : i32
    %0 = arith.cmpi eq, %arg2, %c0_i32 : i32
    %1 = arith.extui %0 : i1 to i32
    %c0_i32_0 = arith.constant 0 : i32
    %2 = arith.cmpi ne, %1, %c0_i32_0 : i32
    scf.if %2 {
      %cst_119 = arith.constant 0xFF800000 : f32
      %162 = vector.broadcast %cst_119 : f32 to vector<4x8x1xf32>
      %c0_120 = arith.constant 0 : index
      %c0_121 = arith.constant 0 : index
      %c0_122 = arith.constant 0 : index
      %163 = vector.load %arg7[%c0_120, %c0_121, %c0_122] : memref<4x8x1xf32, #tpu.memory_space<vmem>>, vector<4x8x1xf32>
      tpu.vector_store %arg7[%c0_120, %c0_121, %c0_122], %162 {strides = array<i32>} : memref<4x8x1xf32, #tpu.memory_space<vmem>>, vector<4x8x1xf32>,
      %cst_123 = arith.constant 0.000000e+00 : f32
      %164 = vector.broadcast %cst_123 : f32 to vector<4x8x1xf32>
      %c0_124 = arith.constant 0 : index
      %c0_125 = arith.constant 0 : index
      %c0_126 = arith.constant 0 : index
      %165 = vector.load %arg8[%c0_124, %c0_125, %c0_126] : memref<4x8x1xf32, #tpu.memory_space<vmem>>, vector<4x8x1xf32>
      tpu.vector_store %arg8[%c0_124, %c0_125, %c0_126], %164 {strides = array<i32>} : memref<4x8x1xf32, #tpu.memory_space<vmem>>, vector<4x8x1xf32>,
      %cst_127 = arith.constant 0.000000e+00 : f32
      %166 = vector.broadcast %cst_127 : f32 to vector<4x8x8xf32>
      %c0_128 = arith.constant 0 : index
      %c0_129 = arith.constant 0 : index
      %c0_130 = arith.constant 0 : index
      %167 = vector.load %arg9[%c0_128, %c0_129, %c0_130] : memref<4x8x8xf32, #tpu.memory_space<vmem>>, vector<4x8x8xf32>
      tpu.vector_store %arg9[%c0_128, %c0_129, %c0_130], %166 {strides = array<i32>} : memref<4x8x8xf32, #tpu.memory_space<vmem>>, vector<4x8x8xf32>,
    } else {
    }
    %c0 = arith.constant 0 : index
    %c0_1 = arith.constant 0 : index
    %c0_2 = arith.constant 0 : index
    %3 = vector.load %arg3[%c0, %c0_1, %c0_2] : memref<1x8x32xbf16, #tpu.memory_space<vmem>>, vector<1x8x8xbf16>
    %4 = vector.shape_cast %3 : vector<1x8x8xbf16> to vector<8x8xbf16>
    %c0_3 = arith.constant 0 : index
    %c0_4 = arith.constant 0 : index
    %c0_5 = arith.constant 0 : index
    %5 = vector.load %arg4[%c0_3, %c0_4, %c0_5] : memref<1x8x32xbf16, #tpu.memory_space<vmem>>, vector<1x8x8xbf16>
    %6 = vector.shape_cast %5 : vector<1x8x8xbf16> to vector<8x8xbf16>
    %c0_6 = arith.constant 0 : index
    %c0_7 = arith.constant 0 : index
    %c0_8 = arith.constant 0 : index
    %7 = vector.load %arg5[%c0_6, %c0_7, %c0_8] : memref<1x8x32xbf16, #tpu.memory_space<vmem>>, vector<1x8x8xbf16>
    %8 = vector.shape_cast %7 : vector<1x8x8xbf16> to vector<8x8xbf16>
    %cst = arith.constant dense<0.000000e+00> : vector<8x8xf32>
    %9 = tpu.matmul %4, %6, %cst {dimension_numbers = #tpu.dot_dimension_numbers<[1], [1], [0], [0], [0, 0, 1, 0], [], []>} : vector<8x8xbf16>, vector<8x8xbf16>, vector<8x8xf32> -> vector<8x8xf32>
    %c0_9 = arith.constant 0 : index
    %c0_10 = arith.constant 0 : index
    %c0_11 = arith.constant 0 : index
    %10 = vector.load %arg7[%c0_9, %c0_10, %c0_11] : memref<4x8x1xf32, #tpu.memory_space<vmem>>, vector<1x8x1xf32>
    %11 = vector.shape_cast %10 : vector<1x8x1xf32> to vector<8x1xf32>
    %cst_12 = arith.constant dense<0xFF800000> : vector<8xf32>
    %12 = vector.multi_reduction <maximumf>, %9, %cst_12 [1] : vector<8x8xf32> to vector<8xf32>
    %13 = vector.shape_cast %12 : vector<8xf32> to vector<8x1xf32>
    %14 = arith.maximumf %11, %13 : vector<8x1xf32>
    %15 = arith.subf %11, %14 : vector<8x1xf32>
    %16 = math.exp %15 : vector<8x1xf32>
    %17 = vector.broadcast %14 : vector<8x1xf32> to vector<8x8xf32>
    %18 = arith.subf %9, %17 : vector<8x8xf32>
    %19 = math.exp %18 : vector<8x8xf32>
    %c0_13 = arith.constant 0 : index
    %c0_14 = arith.constant 0 : index
    %c0_15 = arith.constant 0 : index
    %20 = vector.load %arg8[%c0_13, %c0_14, %c0_15] : memref<4x8x1xf32, #tpu.memory_space<vmem>>, vector<1x8x1xf32>
    %21 = vector.shape_cast %20 : vector<1x8x1xf32> to vector<8x1xf32>
    %22 = arith.mulf %16, %21 : vector<8x1xf32>
    %cst_16 = arith.constant dense<0.000000e+00> : vector<8xf32>
    %23 = vector.multi_reduction <add>, %19, %cst_16 [1] : vector<8x8xf32> to vector<8xf32>
    %24 = vector.shape_cast %23 : vector<8xf32> to vector<8x1xf32>
    %25 = arith.addf %22, %24 : vector<8x1xf32>
    %c0_17 = arith.constant 0 : index
    %c0_18 = arith.constant 0 : index
    %c0_19 = arith.constant 0 : index
    %26 = vector.load %arg8[%c0_17, %c0_18, %c0_19] : memref<4x8x1xf32, #tpu.memory_space<vmem>>, vector<1x8x1xf32>
    %27 = vector.shape_cast %26 : vector<1x8x1xf32> to vector<8x1xf32>
    %28 = vector.shape_cast %25 : vector<8x1xf32> to vector<1x8x1xf32>
    tpu.vector_store %arg8[%c0_17, %c0_18, %c0_19], %28 {strides = array<i32>} : memref<4x8x1xf32, #tpu.memory_space<vmem>>, vector<1x8x1xf32>,
    %c0_20 = arith.constant 0 : index
    %c0_21 = arith.constant 0 : index
    %c0_22 = arith.constant 0 : index
    %29 = vector.load %arg9[%c0_20, %c0_21, %c0_22] : memref<4x8x8xf32, #tpu.memory_space<vmem>>, vector<1x8x8xf32>
    %30 = vector.shape_cast %29 : vector<1x8x8xf32> to vector<8x8xf32>
    %31 = vector.broadcast %16 : vector<8x1xf32> to vector<8x8xf32>
    %32 = arith.mulf %31, %30 : vector<8x8xf32>
    %33 = arith.truncf %19 : vector<8x8xf32> to vector<8x8xbf16>
    %cst_23 = arith.constant dense<0.000000e+00> : vector<8x8xf32>
    %34 = tpu.matmul %33, %8, %cst_23 {dimension_numbers = #tpu.dot_dimension_numbers<[1], [0], [0], [1], [0, 0, 1, 1], [], []>} : vector<8x8xbf16>, vector<8x8xbf16>, vector<8x8xf32> -> vector<8x8xf32>
    %35 = arith.addf %32, %34 : vector<8x8xf32>
    %c0_24 = arith.constant 0 : index
    %c0_25 = arith.constant 0 : index
    %c0_26 = arith.constant 0 : index
    %36 = vector.load %arg9[%c0_24, %c0_25, %c0_26] : memref<4x8x8xf32, #tpu.memory_space<vmem>>, vector<1x8x8xf32>
    %37 = vector.shape_cast %36 : vector<1x8x8xf32> to vector<8x8xf32>
    %38 = vector.shape_cast %35 : vector<8x8xf32> to vector<1x8x8xf32>
    tpu.vector_store %arg9[%c0_24, %c0_25, %c0_26], %38 {strides = array<i32>} : memref<4x8x8xf32, #tpu.memory_space<vmem>>, vector<1x8x8xf32>,
    %c0_27 = arith.constant 0 : index
    %c0_28 = arith.constant 0 : index
    %c0_29 = arith.constant 0 : index
    %39 = vector.load %arg7[%c0_27, %c0_28, %c0_29] : memref<4x8x1xf32, #tpu.memory_space<vmem>>, vector<1x8x1xf32>
    %40 = vector.shape_cast %39 : vector<1x8x1xf32> to vector<8x1xf32>
    %41 = vector.shape_cast %14 : vector<8x1xf32> to vector<1x8x1xf32>
    tpu.vector_store %arg7[%c0_27, %c0_28, %c0_29], %41 {strides = array<i32>} : memref<4x8x1xf32, #tpu.memory_space<vmem>>, vector<1x8x1xf32>,
    %c0_30 = arith.constant 0 : index
    %c0_31 = arith.constant 0 : index
    %c8 = arith.constant 8 : index
    %42 = vector.load %arg3[%c0_30, %c0_31, %c8] : memref<1x8x32xbf16, #tpu.memory_space<vmem>>, vector<1x8x8xbf16>
    %43 = vector.shape_cast %42 : vector<1x8x8xbf16> to vector<8x8xbf16>
    %c0_32 = arith.constant 0 : index
    %c0_33 = arith.constant 0 : index
    %c8_34 = arith.constant 8 : index
    %44 = vector.load %arg4[%c0_32, %c0_33, %c8_34] : memref<1x8x32xbf16, #tpu.memory_space<vmem>>, vector<1x8x8xbf16>
    %45 = vector.shape_cast %44 : vector<1x8x8xbf16> to vector<8x8xbf16>
    %c0_35 = arith.constant 0 : index
    %c0_36 = arith.constant 0 : index
    %c8_37 = arith.constant 8 : index
    %46 = vector.load %arg5[%c0_35, %c0_36, %c8_37] : memref<1x8x32xbf16, #tpu.memory_space<vmem>>, vector<1x8x8xbf16>
    %47 = vector.shape_cast %46 : vector<1x8x8xbf16> to vector<8x8xbf16>
    %cst_38 = arith.constant dense<0.000000e+00> : vector<8x8xf32>
    %48 = tpu.matmul %43, %45, %cst_38 {dimension_numbers = #tpu.dot_dimension_numbers<[1], [1], [0], [0], [0, 0, 1, 0], [], []>} : vector<8x8xbf16>, vector<8x8xbf16>, vector<8x8xf32> -> vector<8x8xf32>
    %c1 = arith.constant 1 : index
    %c0_39 = arith.constant 0 : index
    %c0_40 = arith.constant 0 : index
    %49 = vector.load %arg7[%c1, %c0_39, %c0_40] : memref<4x8x1xf32, #tpu.memory_space<vmem>>, vector<1x8x1xf32>
    %50 = vector.shape_cast %49 : vector<1x8x1xf32> to vector<8x1xf32>
    %cst_41 = arith.constant dense<0xFF800000> : vector<8xf32>
    %51 = vector.multi_reduction <maximumf>, %48, %cst_41 [1] : vector<8x8xf32> to vector<8xf32>
    %52 = vector.shape_cast %51 : vector<8xf32> to vector<8x1xf32>
    %53 = arith.maximumf %50, %52 : vector<8x1xf32>
    %54 = arith.subf %50, %53 : vector<8x1xf32>
    %55 = math.exp %54 : vector<8x1xf32>
    %56 = vector.broadcast %53 : vector<8x1xf32> to vector<8x8xf32>
    %57 = arith.subf %48, %56 : vector<8x8xf32>
    %58 = math.exp %57 : vector<8x8xf32>
    %c1_42 = arith.constant 1 : index
    %c0_43 = arith.constant 0 : index
    %c0_44 = arith.constant 0 : index
    %59 = vector.load %arg8[%c1_42, %c0_43, %c0_44] : memref<4x8x1xf32, #tpu.memory_space<vmem>>, vector<1x8x1xf32>
    %60 = vector.shape_cast %59 : vector<1x8x1xf32> to vector<8x1xf32>
    %61 = arith.mulf %55, %60 : vector<8x1xf32>
    %cst_45 = arith.constant dense<0.000000e+00> : vector<8xf32>
    %62 = vector.multi_reduction <add>, %58, %cst_45 [1] : vector<8x8xf32> to vector<8xf32>
    %63 = vector.shape_cast %62 : vector<8xf32> to vector<8x1xf32>
    %64 = arith.addf %61, %63 : vector<8x1xf32>
    %c1_46 = arith.constant 1 : index
    %c0_47 = arith.constant 0 : index
    %c0_48 = arith.constant 0 : index
    %65 = vector.load %arg8[%c1_46, %c0_47, %c0_48] : memref<4x8x1xf32, #tpu.memory_space<vmem>>, vector<1x8x1xf32>
    %66 = vector.shape_cast %65 : vector<1x8x1xf32> to vector<8x1xf32>
    %67 = vector.shape_cast %64 : vector<8x1xf32> to vector<1x8x1xf32>
    tpu.vector_store %arg8[%c1_46, %c0_47, %c0_48], %67 {strides = array<i32>} : memref<4x8x1xf32, #tpu.memory_space<vmem>>, vector<1x8x1xf32>,
    %c1_49 = arith.constant 1 : index
    %c0_50 = arith.constant 0 : index
    %c0_51 = arith.constant 0 : index
    %68 = vector.load %arg9[%c1_49, %c0_50, %c0_51] : memref<4x8x8xf32, #tpu.memory_space<vmem>>, vector<1x8x8xf32>
    %69 = vector.shape_cast %68 : vector<1x8x8xf32> to vector<8x8xf32>
    %70 = vector.broadcast %55 : vector<8x1xf32> to vector<8x8xf32>
    %71 = arith.mulf %70, %69 : vector<8x8xf32>
    %72 = arith.truncf %58 : vector<8x8xf32> to vector<8x8xbf16>
    %cst_52 = arith.constant dense<0.000000e+00> : vector<8x8xf32>
    %73 = tpu.matmul %72, %47, %cst_52 {dimension_numbers = #tpu.dot_dimension_numbers<[1], [0], [0], [1], [0, 0, 1, 1], [], []>} : vector<8x8xbf16>, vector<8x8xbf16>, vector<8x8xf32> -> vector<8x8xf32>
    %74 = arith.addf %71, %73 : vector<8x8xf32>
    %c1_53 = arith.constant 1 : index
    %c0_54 = arith.constant 0 : index
    %c0_55 = arith.constant 0 : index
    %75 = vector.load %arg9[%c1_53, %c0_54, %c0_55] : memref<4x8x8xf32, #tpu.memory_space<vmem>>, vector<1x8x8xf32>
    %76 = vector.shape_cast %75 : vector<1x8x8xf32> to vector<8x8xf32>
    %77 = vector.shape_cast %74 : vector<8x8xf32> to vector<1x8x8xf32>
    tpu.vector_store %arg9[%c1_53, %c0_54, %c0_55], %77 {strides = array<i32>} : memref<4x8x8xf32, #tpu.memory_space<vmem>>, vector<1x8x8xf32>,
    %c1_56 = arith.constant 1 : index
    %c0_57 = arith.constant 0 : index
    %c0_58 = arith.constant 0 : index
    %78 = vector.load %arg7[%c1_56, %c0_57, %c0_58] : memref<4x8x1xf32, #tpu.memory_space<vmem>>, vector<1x8x1xf32>
    %79 = vector.shape_cast %78 : vector<1x8x1xf32> to vector<8x1xf32>
    %80 = vector.shape_cast %53 : vector<8x1xf32> to vector<1x8x1xf32>
    tpu.vector_store %arg7[%c1_56, %c0_57, %c0_58], %80 {strides = array<i32>} : memref<4x8x1xf32, #tpu.memory_space<vmem>>, vector<1x8x1xf32>,
    %c0_59 = arith.constant 0 : index
    %c0_60 = arith.constant 0 : index
    %c16 = arith.constant 16 : index
    %81 = vector.load %arg3[%c0_59, %c0_60, %c16] : memref<1x8x32xbf16, #tpu.memory_space<vmem>>, vector<1x8x8xbf16>
    %82 = vector.shape_cast %81 : vector<1x8x8xbf16> to vector<8x8xbf16>
    %c0_61 = arith.constant 0 : index
    %c0_62 = arith.constant 0 : index
    %c16_63 = arith.constant 16 : index
    %83 = vector.load %arg4[%c0_61, %c0_62, %c16_63] : memref<1x8x32xbf16, #tpu.memory_space<vmem>>, vector<1x8x8xbf16>
    %84 = vector.shape_cast %83 : vector<1x8x8xbf16> to vector<8x8xbf16>
    %c0_64 = arith.constant 0 : index
    %c0_65 = arith.constant 0 : index
    %c16_66 = arith.constant 16 : index
    %85 = vector.load %arg5[%c0_64, %c0_65, %c16_66] : memref<1x8x32xbf16, #tpu.memory_space<vmem>>, vector<1x8x8xbf16>
    %86 = vector.shape_cast %85 : vector<1x8x8xbf16> to vector<8x8xbf16>
    %cst_67 = arith.constant dense<0.000000e+00> : vector<8x8xf32>
    %87 = tpu.matmul %82, %84, %cst_67 {dimension_numbers = #tpu.dot_dimension_numbers<[1], [1], [0], [0], [0, 0, 1, 0], [], []>} : vector<8x8xbf16>, vector<8x8xbf16>, vector<8x8xf32> -> vector<8x8xf32>
    %c2 = arith.constant 2 : index
    %c0_68 = arith.constant 0 : index
    %c0_69 = arith.constant 0 : index
    %88 = vector.load %arg7[%c2, %c0_68, %c0_69] : memref<4x8x1xf32, #tpu.memory_space<vmem>>, vector<1x8x1xf32>
    %89 = vector.shape_cast %88 : vector<1x8x1xf32> to vector<8x1xf32>
    %cst_70 = arith.constant dense<0xFF800000> : vector<8xf32>
    %90 = vector.multi_reduction <maximumf>, %87, %cst_70 [1] : vector<8x8xf32> to vector<8xf32>
    %91 = vector.shape_cast %90 : vector<8xf32> to vector<8x1xf32>
    %92 = arith.maximumf %89, %91 : vector<8x1xf32>
    %93 = arith.subf %89, %92 : vector<8x1xf32>
    %94 = math.exp %93 : vector<8x1xf32>
    %95 = vector.broadcast %92 : vector<8x1xf32> to vector<8x8xf32>
    %96 = arith.subf %87, %95 : vector<8x8xf32>
    %97 = math.exp %96 : vector<8x8xf32>
    %c2_71 = arith.constant 2 : index
    %c0_72 = arith.constant 0 : index
    %c0_73 = arith.constant 0 : index
    %98 = vector.load %arg8[%c2_71, %c0_72, %c0_73] : memref<4x8x1xf32, #tpu.memory_space<vmem>>, vector<1x8x1xf32>
    %99 = vector.shape_cast %98 : vector<1x8x1xf32> to vector<8x1xf32>
    %100 = arith.mulf %94, %99 : vector<8x1xf32>
    %cst_74 = arith.constant dense<0.000000e+00> : vector<8xf32>
    %101 = vector.multi_reduction <add>, %97, %cst_74 [1] : vector<8x8xf32> to vector<8xf32>
    %102 = vector.shape_cast %101 : vector<8xf32> to vector<8x1xf32>
    %103 = arith.addf %100, %102 : vector<8x1xf32>
    %c2_75 = arith.constant 2 : index
    %c0_76 = arith.constant 0 : index
    %c0_77 = arith.constant 0 : index
    %104 = vector.load %arg8[%c2_75, %c0_76, %c0_77] : memref<4x8x1xf32, #tpu.memory_space<vmem>>, vector<1x8x1xf32>
    %105 = vector.shape_cast %104 : vector<1x8x1xf32> to vector<8x1xf32>
    %106 = vector.shape_cast %103 : vector<8x1xf32> to vector<1x8x1xf32>
    tpu.vector_store %arg8[%c2_75, %c0_76, %c0_77], %106 {strides = array<i32>} : memref<4x8x1xf32, #tpu.memory_space<vmem>>, vector<1x8x1xf32>,
    %c2_78 = arith.constant 2 : index
    %c0_79 = arith.constant 0 : index
    %c0_80 = arith.constant 0 : index
    %107 = vector.load %arg9[%c2_78, %c0_79, %c0_80] : memref<4x8x8xf32, #tpu.memory_space<vmem>>, vector<1x8x8xf32>
    %108 = vector.shape_cast %107 : vector<1x8x8xf32> to vector<8x8xf32>
    %109 = vector.broadcast %94 : vector<8x1xf32> to vector<8x8xf32>
    %110 = arith.mulf %109, %108 : vector<8x8xf32>
    %111 = arith.truncf %97 : vector<8x8xf32> to vector<8x8xbf16>
    %cst_81 = arith.constant dense<0.000000e+00> : vector<8x8xf32>
    %112 = tpu.matmul %111, %86, %cst_81 {dimension_numbers = #tpu.dot_dimension_numbers<[1], [0], [0], [1], [0, 0, 1, 1], [], []>} : vector<8x8xbf16>, vector<8x8xbf16>, vector<8x8xf32> -> vector<8x8xf32>
    %113 = arith.addf %110, %112 : vector<8x8xf32>
    %c2_82 = arith.constant 2 : index
    %c0_83 = arith.constant 0 : index
    %c0_84 = arith.constant 0 : index
    %114 = vector.load %arg9[%c2_82, %c0_83, %c0_84] : memref<4x8x8xf32, #tpu.memory_space<vmem>>, vector<1x8x8xf32>
    %115 = vector.shape_cast %114 : vector<1x8x8xf32> to vector<8x8xf32>
    %116 = vector.shape_cast %113 : vector<8x8xf32> to vector<1x8x8xf32>
    tpu.vector_store %arg9[%c2_82, %c0_83, %c0_84], %116 {strides = array<i32>} : memref<4x8x8xf32, #tpu.memory_space<vmem>>, vector<1x8x8xf32>,
    %c2_85 = arith.constant 2 : index
    %c0_86 = arith.constant 0 : index
    %c0_87 = arith.constant 0 : index
    %117 = vector.load %arg7[%c2_85, %c0_86, %c0_87] : memref<4x8x1xf32, #tpu.memory_space<vmem>>, vector<1x8x1xf32>
    %118 = vector.shape_cast %117 : vector<1x8x1xf32> to vector<8x1xf32>
    %119 = vector.shape_cast %92 : vector<8x1xf32> to vector<1x8x1xf32>
    tpu.vector_store %arg7[%c2_85, %c0_86, %c0_87], %119 {strides = array<i32>} : memref<4x8x1xf32, #tpu.memory_space<vmem>>, vector<1x8x1xf32>,
    %c0_88 = arith.constant 0 : index
    %c0_89 = arith.constant 0 : index
    %c24 = arith.constant 24 : index
    %120 = vector.load %arg3[%c0_88, %c0_89, %c24] : memref<1x8x32xbf16, #tpu.memory_space<vmem>>, vector<1x8x8xbf16>
    %121 = vector.shape_cast %120 : vector<1x8x8xbf16> to vector<8x8xbf16>
    %c0_90 = arith.constant 0 : index
    %c0_91 = arith.constant 0 : index
    %c24_92 = arith.constant 24 : index
    %122 = vector.load %arg4[%c0_90, %c0_91, %c24_92] : memref<1x8x32xbf16, #tpu.memory_space<vmem>>, vector<1x8x8xbf16>
    %123 = vector.shape_cast %122 : vector<1x8x8xbf16> to vector<8x8xbf16>
    %c0_93 = arith.constant 0 : index
    %c0_94 = arith.constant 0 : index
    %c24_95 = arith.constant 24 : index
    %124 = vector.load %arg5[%c0_93, %c0_94, %c24_95] : memref<1x8x32xbf16, #tpu.memory_space<vmem>>, vector<1x8x8xbf16>
    %125 = vector.shape_cast %124 : vector<1x8x8xbf16> to vector<8x8xbf16>
    %cst_96 = arith.constant dense<0.000000e+00> : vector<8x8xf32>
    %126 = tpu.matmul %121, %123, %cst_96 {dimension_numbers = #tpu.dot_dimension_numbers<[1], [1], [0], [0], [0, 0, 1, 0], [], []>} : vector<8x8xbf16>, vector<8x8xbf16>, vector<8x8xf32> -> vector<8x8xf32>
    %c3 = arith.constant 3 : index
    %c0_97 = arith.constant 0 : index
    %c0_98 = arith.constant 0 : index
    %127 = vector.load %arg7[%c3, %c0_97, %c0_98] : memref<4x8x1xf32, #tpu.memory_space<vmem>>, vector<1x8x1xf32>
    %128 = vector.shape_cast %127 : vector<1x8x1xf32> to vector<8x1xf32>
    %cst_99 = arith.constant dense<0xFF800000> : vector<8xf32>
    %129 = vector.multi_reduction <maximumf>, %126, %cst_99 [1] : vector<8x8xf32> to vector<8xf32>
    %130 = vector.shape_cast %129 : vector<8xf32> to vector<8x1xf32>
    %131 = arith.maximumf %128, %130 : vector<8x1xf32>
    %132 = arith.subf %128, %131 : vector<8x1xf32>
    %133 = math.exp %132 : vector<8x1xf32>
    %134 = vector.broadcast %131 : vector<8x1xf32> to vector<8x8xf32>
    %135 = arith.subf %126, %134 : vector<8x8xf32>
    %136 = math.exp %135 : vector<8x8xf32>
    %c3_100 = arith.constant 3 : index
    %c0_101 = arith.constant 0 : index
    %c0_102 = arith.constant 0 : index
    %137 = vector.load %arg8[%c3_100, %c0_101, %c0_102] : memref<4x8x1xf32, #tpu.memory_space<vmem>>, vector<1x8x1xf32>
    %138 = vector.shape_cast %137 : vector<1x8x1xf32> to vector<8x1xf32>
    %139 = arith.mulf %133, %138 : vector<8x1xf32>
    %cst_103 = arith.constant dense<0.000000e+00> : vector<8xf32>
    %140 = vector.multi_reduction <add>, %136, %cst_103 [1] : vector<8x8xf32> to vector<8xf32>
    %141 = vector.shape_cast %140 : vector<8xf32> to vector<8x1xf32>
    %142 = arith.addf %139, %141 : vector<8x1xf32>
    %c3_104 = arith.constant 3 : index
    %c0_105 = arith.constant 0 : index
    %c0_106 = arith.constant 0 : index
    %143 = vector.load %arg8[%c3_104, %c0_105, %c0_106] : memref<4x8x1xf32, #tpu.memory_space<vmem>>, vector<1x8x1xf32>
    %144 = vector.shape_cast %143 : vector<1x8x1xf32> to vector<8x1xf32>
    %145 = vector.shape_cast %142 : vector<8x1xf32> to vector<1x8x1xf32>
    tpu.vector_store %arg8[%c3_104, %c0_105, %c0_106], %145 {strides = array<i32>} : memref<4x8x1xf32, #tpu.memory_space<vmem>>, vector<1x8x1xf32>,
    %c3_107 = arith.constant 3 : index
    %c0_108 = arith.constant 0 : index
    %c0_109 = arith.constant 0 : index
    %146 = vector.load %arg9[%c3_107, %c0_108, %c0_109] : memref<4x8x8xf32, #tpu.memory_space<vmem>>, vector<1x8x8xf32>
    %147 = vector.shape_cast %146 : vector<1x8x8xf32> to vector<8x8xf32>
    %148 = vector.broadcast %133 : vector<8x1xf32> to vector<8x8xf32>
    %149 = arith.mulf %148, %147 : vector<8x8xf32>
    %150 = arith.truncf %136 : vector<8x8xf32> to vector<8x8xbf16>
    %cst_110 = arith.constant dense<0.000000e+00> : vector<8x8xf32>
    %151 = tpu.matmul %150, %125, %cst_110 {dimension_numbers = #tpu.dot_dimension_numbers<[1], [0], [0], [1], [0, 0, 1, 1], [], []>} : vector<8x8xbf16>, vector<8x8xbf16>, vector<8x8xf32> -> vector<8x8xf32>
    %152 = arith.addf %149, %151 : vector<8x8xf32>
    %c3_111 = arith.constant 3 : index
    %c0_112 = arith.constant 0 : index
    %c0_113 = arith.constant 0 : index
    %153 = vector.load %arg9[%c3_111, %c0_112, %c0_113] : memref<4x8x8xf32, #tpu.memory_space<vmem>>, vector<1x8x8xf32>
    %154 = vector.shape_cast %153 : vector<1x8x8xf32> to vector<8x8xf32>
    %155 = vector.shape_cast %152 : vector<8x8xf32> to vector<1x8x8xf32>
    tpu.vector_store %arg9[%c3_111, %c0_112, %c0_113], %155 {strides = array<i32>} : memref<4x8x8xf32, #tpu.memory_space<vmem>>, vector<1x8x8xf32>,
    %c3_114 = arith.constant 3 : index
    %c0_115 = arith.constant 0 : index
    %c0_116 = arith.constant 0 : index
    %156 = vector.load %arg7[%c3_114, %c0_115, %c0_116] : memref<4x8x1xf32, #tpu.memory_space<vmem>>, vector<1x8x1xf32>
    %157 = vector.shape_cast %156 : vector<1x8x1xf32> to vector<8x1xf32>
    %158 = vector.shape_cast %131 : vector<8x1xf32> to vector<1x8x1xf32>
    tpu.vector_store %arg7[%c3_114, %c0_115, %c0_116], %158 {strides = array<i32>} : memref<4x8x1xf32, #tpu.memory_space<vmem>>, vector<1x8x1xf32>,
    %c0_i32_117 = arith.constant 0 : i32
    %159 = arith.cmpi eq, %arg2, %c0_i32_117 : i32
    %160 = arith.extui %159 : i1 to i32
    %c0_i32_118 = arith.constant 0 : i32
    %161 = arith.cmpi ne, %160, %c0_i32_118 : i32
    scf.if %161 {
      %c0_119 = arith.constant 0 : index
      %c0_120 = arith.constant 0 : index
      %c0_121 = arith.constant 0 : index
      %162 = vector.load %arg8[%c0_119, %c0_120, %c0_121] : memref<4x8x1xf32, #tpu.memory_space<vmem>>, vector<1x8x1xf32>
      %163 = vector.shape_cast %162 : vector<1x8x1xf32> to vector<8x1xf32>
      %cst_122 = arith.constant 1.000000e+00 : f32
      %164 = vector.broadcast %cst_122 : f32 to vector<8x1xf32>
      %165 = arith.divf %164, %163 : vector<8x1xf32>
      %c0_123 = arith.constant 0 : index
      %c0_124 = arith.constant 0 : index
      %c0_125 = arith.constant 0 : index
      %166 = vector.load %arg9[%c0_123, %c0_124, %c0_125] : memref<4x8x8xf32, #tpu.memory_space<vmem>>, vector<1x8x8xf32>
      %167 = vector.shape_cast %166 : vector<1x8x8xf32> to vector<8x8xf32>
      %168 = vector.broadcast %165 : vector<8x1xf32> to vector<8x8xf32>
      %169 = arith.mulf %167, %168 : vector<8x8xf32>
      %c1_126 = arith.constant 1 : index
      %c0_127 = arith.constant 0 : index
      %c0_128 = arith.constant 0 : index
      %170 = vector.load %arg8[%c1_126, %c0_127, %c0_128] : memref<4x8x1xf32, #tpu.memory_space<vmem>>, vector<1x8x1xf32>
      %171 = vector.shape_cast %170 : vector<1x8x1xf32> to vector<8x1xf32>
      %cst_129 = arith.constant 1.000000e+00 : f32
      %172 = vector.broadcast %cst_129 : f32 to vector<8x1xf32>
      %173 = arith.divf %172, %171 : vector<8x1xf32>
      %c1_130 = arith.constant 1 : index
      %c0_131 = arith.constant 0 : index
      %c0_132 = arith.constant 0 : index
      %174 = vector.load %arg9[%c1_130, %c0_131, %c0_132] : memref<4x8x8xf32, #tpu.memory_space<vmem>>, vector<1x8x8xf32>
      %175 = vector.shape_cast %174 : vector<1x8x8xf32> to vector<8x8xf32>
      %176 = vector.broadcast %173 : vector<8x1xf32> to vector<8x8xf32>
      %177 = arith.mulf %175, %176 : vector<8x8xf32>
      %c2_133 = arith.constant 2 : index
      %c0_134 = arith.constant 0 : index
      %c0_135 = arith.constant 0 : index
      %178 = vector.load %arg8[%c2_133, %c0_134, %c0_135] : memref<4x8x1xf32, #tpu.memory_space<vmem>>, vector<1x8x1xf32>
      %179 = vector.shape_cast %178 : vector<1x8x1xf32> to vector<8x1xf32>
      %cst_136 = arith.constant 1.000000e+00 : f32
      %180 = vector.broadcast %cst_136 : f32 to vector<8x1xf32>
      %181 = arith.divf %180, %179 : vector<8x1xf32>
      %c2_137 = arith.constant 2 : index
      %c0_138 = arith.constant 0 : index
      %c0_139 = arith.constant 0 : index
      %182 = vector.load %arg9[%c2_137, %c0_138, %c0_139] : memref<4x8x8xf32, #tpu.memory_space<vmem>>, vector<1x8x8xf32>
      %183 = vector.shape_cast %182 : vector<1x8x8xf32> to vector<8x8xf32>
      %184 = vector.broadcast %181 : vector<8x1xf32> to vector<8x8xf32>
      %185 = arith.mulf %183, %184 : vector<8x8xf32>
      %c3_140 = arith.constant 3 : index
      %c0_141 = arith.constant 0 : index
      %c0_142 = arith.constant 0 : index
      %186 = vector.load %arg8[%c3_140, %c0_141, %c0_142] : memref<4x8x1xf32, #tpu.memory_space<vmem>>, vector<1x8x1xf32>
      %187 = vector.shape_cast %186 : vector<1x8x1xf32> to vector<8x1xf32>
      %cst_143 = arith.constant 1.000000e+00 : f32
      %188 = vector.broadcast %cst_143 : f32 to vector<8x1xf32>
      %189 = arith.divf %188, %187 : vector<8x1xf32>
      %c3_144 = arith.constant 3 : index
      %c0_145 = arith.constant 0 : index
      %c0_146 = arith.constant 0 : index
      %190 = vector.load %arg9[%c3_144, %c0_145, %c0_146] : memref<4x8x8xf32, #tpu.memory_space<vmem>>, vector<1x8x8xf32>
      %191 = vector.shape_cast %190 : vector<1x8x8xf32> to vector<8x8xf32>
      %192 = vector.broadcast %189 : vector<8x1xf32> to vector<8x8xf32>
      %193 = arith.mulf %191, %192 : vector<8x8xf32>
      %194 = tpu.concatenate %169, %177, %185, %193 in 1 : vector<8x8xf32>, vector<8x8xf32>, vector<8x8xf32>, vector<8x8xf32> -> vector<8x32xf32>
      %195 = arith.truncf %194 : vector<8x32xf32> to vector<8x32xbf16>
      %c0_147 = arith.constant 0 : index
      %c0_148 = arith.constant 0 : index
      %c0_149 = arith.constant 0 : index
      %196 = vector.load %arg6[%c0_147, %c0_148, %c0_149] : memref<1x8x32xbf16, #tpu.memory_space<vmem>>, vector<1x8x32xbf16>
      %197 = vector.shape_cast %196 : vector<1x8x32xbf16> to vector<8x32xbf16>
      %198 = vector.shape_cast %195 : vector<8x32xbf16> to vector<1x8x32xbf16>
      tpu.vector_store %arg6[%c0_147, %c0_148, %c0_149], %198 {strides = array<i32>} : memref<1x8x32xbf16, #tpu.memory_space<vmem>>, vector<1x8x32xbf16>,
    } else {
    }
    return
  }
  func.func @transform_0(%arg0: i32, %arg1: i32, %arg2: i32) -> (i32, i32, i32) {
    %c0_i32 = arith.constant 0 : i32
    %c0_i32_0 = arith.constant 0 : i32
    return %arg0, %arg1, %c0_i32 : i32, i32, i32
  }
  func.func @transform_1(%arg0: i32, %arg1: i32, %arg2: i32) -> (i32, i32, i32) {
    %c0_i32 = arith.constant 0 : i32
    %c0_i32_0 = arith.constant 0 : i32
    return %arg0, %arg2, %c0_i32 : i32, i32, i32
  }
  func.func @transform_2(%arg0: i32, %arg1: i32, %arg2: i32) -> (i32, i32, i32) {
    %c0_i32 = arith.constant 0 : i32
    %c0_i32_0 = arith.constant 0 : i32
    return %arg0, %arg2, %c0_i32 : i32, i32, i32
  }
  func.func @transform_3(%arg0: i32, %arg1: i32, %arg2: i32) -> (i32, i32, i32) {
    %c0_i32 = arith.constant 0 : i32
    %c0_i32_0 = arith.constant 0 : i32
    return %arg0, %arg1, %c0_i32 : i32, i32, i32
  }
}

module attributes {stable_mosaic.version = 11 : i64} {
  func.func @_matmul_bias_kernel(%arg0: i32, %arg1: i32, %arg2: i32, %arg3: memref<16x32xbf16, #tpu.memory_space<vmem>>, %arg4: memref<32x32xbf16, #tpu.memory_space<vmem>>, %arg5: memref<1x32xf32, #tpu.memory_space<vmem>>, %arg6: memref<16x32xf32, #tpu.memory_space<vmem>>, %arg7: memref<16x32xf32, #tpu.memory_space<vmem>>) attributes {dimension_semantics = [#tpu.dimension_semantics<parallel>, #tpu.dimension_semantics<parallel>, #tpu.dimension_semantics<arbitrary>], iteration_bounds = array<i64: 1, 1, 1>, scalar_prefetch = 0 : i64, scratch_operands = 1 : i64, tpu.core_type = #tpu.core_type<tc>, window_params = [{transform_indices = @transform_0, window_bounds = array<i64: 16, 32>}, {transform_indices = @transform_1, window_bounds = array<i64: 32, 32>}, {transform_indices = @transform_2, window_bounds = array<i64: 1, 32>}, {transform_indices = @transform_3, window_bounds = array<i64: 16, 32>}]} {
    %c0_i32 = arith.constant 0 : i32
    %0 = arith.cmpi eq, %arg2, %c0_i32 : i32
    %1 = arith.extui %0 : i1 to i32
    %c0_i32_0 = arith.constant 0 : i32
    %2 = arith.cmpi ne, %1, %c0_i32_0 : i32
    scf.if %2 {
      %cst_10 = arith.constant 0.000000e+00 : f32
      %12 = vector.broadcast %cst_10 : f32 to vector<16x32xf32>
      %c0_11 = arith.constant 0 : index
      %c0_12 = arith.constant 0 : index
      %13 = vector.load %arg7[%c0_11, %c0_12] : memref<16x32xf32, #tpu.memory_space<vmem>>, vector<16x32xf32>
      tpu.vector_store %arg7[%c0_11, %c0_12], %12 {strides = array<i32>} : memref<16x32xf32, #tpu.memory_space<vmem>>, vector<16x32xf32>,
    } else {
    }
    %c0 = arith.constant 0 : index
    %c0_1 = arith.constant 0 : index
    %3 = vector.load %arg7[%c0, %c0_1] : memref<16x32xf32, #tpu.memory_space<vmem>>, vector<16x32xf32>
    %c0_2 = arith.constant 0 : index
    %c0_3 = arith.constant 0 : index
    %4 = vector.load %arg3[%c0_2, %c0_3] : memref<16x32xbf16, #tpu.memory_space<vmem>>, vector<16x32xbf16>
    %c0_4 = arith.constant 0 : index
    %c0_5 = arith.constant 0 : index
    %5 = vector.load %arg4[%c0_4, %c0_5] : memref<32x32xbf16, #tpu.memory_space<vmem>>, vector<32x32xbf16>
    %cst = arith.constant dense<0.000000e+00> : vector<16x32xf32>
    %6 = tpu.matmul %4, %5, %cst {dimension_numbers = #tpu.dot_dimension_numbers<[1], [0], [0], [1], [0, 0, 1, 1], [], []>} : vector<16x32xbf16>, vector<32x32xbf16>, vector<16x32xf32> -> vector<16x32xf32>
    %7 = arith.addf %3, %6 : vector<16x32xf32>
    %c0_6 = arith.constant 0 : index
    %c0_7 = arith.constant 0 : index
    %8 = vector.load %arg7[%c0_6, %c0_7] : memref<16x32xf32, #tpu.memory_space<vmem>>, vector<16x32xf32>
    tpu.vector_store %arg7[%c0_6, %c0_7], %7 {strides = array<i32>} : memref<16x32xf32, #tpu.memory_space<vmem>>, vector<16x32xf32>,
    %c0_i32_8 = arith.constant 0 : i32
    %9 = arith.cmpi eq, %arg2, %c0_i32_8 : i32
    %10 = arith.extui %9 : i1 to i32
    %c0_i32_9 = arith.constant 0 : i32
    %11 = arith.cmpi ne, %10, %c0_i32_9 : i32
    scf.if %11 {
      %c0_10 = arith.constant 0 : index
      %c0_11 = arith.constant 0 : index
      %12 = vector.load %arg7[%c0_10, %c0_11] : memref<16x32xf32, #tpu.memory_space<vmem>>, vector<16x32xf32>
      %c0_12 = arith.constant 0 : index
      %c0_13 = arith.constant 0 : index
      %13 = vector.load %arg5[%c0_12, %c0_13] : memref<1x32xf32, #tpu.memory_space<vmem>>, vector<1x32xf32>
      %14 = vector.broadcast %13 : vector<1x32xf32> to vector<16x32xf32>
      %15 = arith.addf %12, %14 : vector<16x32xf32>
      %c0_14 = arith.constant 0 : index
      %c0_15 = arith.constant 0 : index
      %16 = vector.load %arg6[%c0_14, %c0_15] : memref<16x32xf32, #tpu.memory_space<vmem>>, vector<16x32xf32>
      tpu.vector_store %arg6[%c0_14, %c0_15], %15 {strides = array<i32>} : memref<16x32xf32, #tpu.memory_space<vmem>>, vector<16x32xf32>,
    } else {
    }
    return
  }
  func.func @transform_0(%arg0: i32, %arg1: i32, %arg2: i32) -> (i32, i32) {
    %c0_i32 = arith.constant 0 : i32
    return %arg0, %arg2 : i32, i32
  }
  func.func @transform_1(%arg0: i32, %arg1: i32, %arg2: i32) -> (i32, i32) {
    %c0_i32 = arith.constant 0 : i32
    return %arg2, %arg1 : i32, i32
  }
  func.func @transform_2(%arg0: i32, %arg1: i32, %arg2: i32) -> (i32, i32) {
    %c0_i32 = arith.constant 0 : i32
    %c0_i32_0 = arith.constant 0 : i32
    return %c0_i32, %arg1 : i32, i32
  }
  func.func @transform_3(%arg0: i32, %arg1: i32, %arg2: i32) -> (i32, i32) {
    %c0_i32 = arith.constant 0 : i32
    return %arg0, %arg1 : i32, i32
  }
}

</mosaic_0001>

<bundles_post_ra>
// kernel: self_attention_pallas.5
= control target key start
LH: loop header
LB: loop body
LE: loop exit
PB: predicated region body
PF: predicated region fallthrough
CT: control target
= control target key end

     0   :  { %v175_v1 = vmov 0.0   ;;  %vm176_vm0 = vmmov 0   ;;  %vm20_vm1 = vcmask 261120   ;;  %s222_s0 = inlined_call_operand.vmem [shape: bf16[16,32], index: 0, kind: input, shape index: {}]   ;;  %s223_s1 = inlined_call_operand.vmem [shape: bf16[32,32], index: 1, kind: input, shape index: {}]   ;;  %s224_s2 = inlined_call_operand.vmem [shape: f32[1,32], index: 2, kind: input, shape index: {}]   ;;  %s225_s3 = inlined_call_operand.hbm [shape: f32[16,32], index: 3, kind: output, shape index: {}]  }
   0x1   :  { %v150_v0 = vld [vmem:[%s223_s1 + $0x8] sm:$0xff]   ;;  %137 = vmatprep.subr.bf16.mxu0 %v175_v1  ;;  %v151_v2 = vld [vmem:[%s223_s1] sm:$0xff]   ;;  %141 = vmatprep.mubr.msk.bf16.mxu0 %vm176_vm0, %v175_v1  ;;  %21 = vst.msk [vmem:[#allocation2] sm:$0xff] %vm20_vm1, %v175_v1  ;;  %22 = vst.msk [vmem:[#allocation2 + $0x8] sm:$0xff] %vm20_vm1, %v175_v1 }
   0x2   :  { %138 = vmatpush3.bf16.msra.mxu0 %v150_v0 }
   0x3   :  { %139 = vmatprep.subr.bf16.mxu0 %v175_v1 }
   0x4   :  { %8 = vsyncpa [#allocation4], 0  ;;  %v152_v3 = vld [vmem:[%s222_s0] sm:$0xff]   ;;  %s177_s0 = smov [#allocation3]  }
   0x5   :  { %v133_v12 = vld [vmem:[%s224_s2] ss:$0 sm:$0xff]  ;;  %s118_s19 = sshll.u32 %s177_s0, 4  ;;  %s119_s19 = int_to_ptr.vmem [resolvable:$true] %s118_s19 }
   0x6   :  { %140 = vmatpush3.bf16.msra.mxu0 %v151_v2  ;;  %s153_s20 = scalar_lea.vmem %s119_s19, 256  ;;  %p158_p1 = scmp.lt.s32.totalorder %s119_s19, %s119_s19 }
   0x7   :  { %p154_p0 = scmp.ne.s32.totalorder %s119_s19, %s153_s20  ;;  %p159_p2 = scmp.lt.s32.totalorder %s153_s20, %s153_s20 }
   0x8   :  { %v23_v4 = vld [vmem:[#allocation2] sm:$0xff]  ;;  %v24_v8 = vld [vmem:[#allocation2 + $0x8] sm:$0xff] }
   0x9   :  { %142 = vmatmul.mubr.msk.bf16.vlgmr.msra.gmra.mxu0 %vm20_vm1, %v152_v3  ;;  %p160_p3 = por %p159_p2, %p158_p1 }
   0xb   :  { %p161_p4 = pnand %p160_p3, %p154_p0 }
  0xc9   :  { %v86_v5 = vpop.f32.mrf.mxu0 }
  0xca   :  { %v93_v6 = vadd.f32 %v86_v5, %v23_v4 }
  0xcb   :  { %v143_v7 = vpop.f32.mrf.mxu0 }
  0xcc   :  { %95 = vst.msk [vmem:[#allocation2] sm:$0xff] %vm20_vm1, %v93_v6 }
  0xcd   :  { %v89_v9 = vpop.f32.mrf.mxu0 }
  0xce   :  { %v94_v10 = vadd.f32 %v89_v9, %v24_v8 }
  0xcf   :  { %v144_v11 = vpop.f32.mrf.mxu0 }
  0xd0   :  { %96 = vst.msk [vmem:[#allocation2 + $0x8] sm:$0xff] %vm20_vm1, %v94_v10 }
  0xd3   :  { %v100_v13 = vld [vmem:[#allocation2] sm:$0xff] }
  0xd4   :  { %v109_v14 = vadd.f32 %v133_v12, %v100_v13 }
  0xd6   :  { %111 = vst.msk [vmem:[#allocation3] sm:$0xff] %vm20_vm1, %v109_v14 }
  0xd7   :  { %v101_v15 = vld [vmem:[#allocation2 + $0x8] sm:$0xff] }
  0xd8   :  { %v110_v16 = vadd.f32 %v133_v12, %v101_v15 }
  0xda   :  { %112 = vst.msk [vmem:[#allocation3 + $0x8] sm:$0xff] %vm20_vm1, %v110_v16 }
  0xdb   :  { %164 = shalt.err (!%p161_p4)
}
  0xdc   :  { %s178_s21 = smov 128   ;;  %s179_s2 = smov 8  }
  0xdd   :  { %124 = dma.vmem_to_hbm [thread:$0]  %s119_s19, 256, %s225_s3, [#allocation4], %s178_s21, %s178_s21, %s179_s2  }
  0xde   :  { %173 = dma.done.wait [#allocation4], 256  }
  0xdf   :  { %174 = vsyncadd [#allocation4], 4294967040 }
  0xe0   :  { %128 = vsyncpa [#allocation4], 1 }

// kernel: self_attention_pallas.3
= control target key start
LH: loop header
LB: loop body
LE: loop exit
PB: predicated region body
PF: predicated region fallthrough
CT: control target
= control target key end

     0   :  { %vm22_vm0 = vcmask 785408   ;;  %v180_v0 = vmov 0.0   ;;  %vm181_vm1 = vmmov 0   ;;  %vm50_vm2 = vcmask 261120   ;;  %s183_s27 = smov 96   ;;  %s254_s1 = inlined_call_operand.vmem [shape: bf16[32,96], index: 1, kind: input, shape index: {}]   ;;  %s255_s0 = inlined_call_operand.vmem [shape: bf16[16,32], index: 0, kind: input, shape index: {}]   ;;  %s256_s2 = inlined_call_operand.vmem [shape: f32[1,96], index: 2, kind: input, shape index: {}]   ;;  %s257_s3 = inlined_call_operand.vmem [shape: bf16[16,32], index: 3, kind: output, shape index: {0}]   ;;  %s258_s5 = inlined_call_operand.vmem [shape: bf16[16,32], index: 5, kind: output, shape index: {2}]   ;;  %s259_s4 = inlined_call_operand.vmem [shape: bf16[16,32], index: 4, kind: output, shape index: {1}]  }
   0x1   :  { %165 = vmatprep.subr.bf16.mxu0 %v180_v0  ;;  %v177_v1 = vld [vmem:[%s254_s1 + $0x8] sm:$0xff]   ;;  %169 = vmatprep.mubr.msk.bf16.mxu0 %vm181_vm1, %v180_v0  ;;  %23 = vst.msk [vmem:[#allocation2] sm:$0xff] %vm22_vm0, %v180_v0  ;;  %24 = vst.msk [vmem:[#allocation2 + $0x8] sm:$0xff] %vm22_vm0, %v180_v0  ;;  %v178_v2 = vld [vmem:[%s254_s1] sm:$0xff]   ;;  %vm122_vm3 = vcmask 257024  }
   0x2   :  { %166 = vmatpush3.bf16.msra.mxu0 %v177_v1  ;;  %v179_v3 = vld [vmem:[%s255_s0] sm:$0xff]   ;;  %s182_s0 = smov 64  }
   0x3   :  { %167 = vmatprep.subr.bf16.mxu0 %v180_v0  ;;  %v157_v12 = vld [vmem:[%s256_s2] ss:$0 sm:$0xff] }
   0x6   :  { %168 = vmatpush3.bf16.msra.mxu0 %v178_v2 }
   0x8   :  { %v25_v4 = vld [vmem:[#allocation2] sm:$0xff]  ;;  %v26_v8 = vld [vmem:[#allocation2 + $0x8] sm:$0xff] }
   0x9   :  { %170 = vmatmul.mubr.msk.bf16.vlgmr.msra.gmra.mxu0 %vm50_vm2, %v179_v3 }
  0xc9   :  { %v88_v5 = vpop.f32.mrf.mxu0 }
  0xca   :  { %v95_v6 = vadd.f32 %v88_v5, %v25_v4 }
  0xcb   :  { %v171_v7 = vpop.f32.mrf.mxu0 }
  0xcc   :  { %98 = vst.msk [vmem:[#allocation2] sm:$0xff] %vm22_vm0, %v95_v6 }
  0xcd   :  { %v91_v9 = vpop.f32.mrf.mxu0 }
  0xce   :  { %v96_v10 = vadd.f32 %v91_v9, %v26_v8 }
  0xcf   :  { %v172_v11 = vpop.f32.mrf.mxu0 }
  0xd0   :  { %99 = vst.msk [vmem:[#allocation2 + $0x8] sm:$0xff] %vm22_vm0, %v96_v10 }
  0xd3   :  { %v103_v13 = vld [vmem:[#allocation2] sm:$0xff] }
  0xd4   :  { %v112_v14 = vadd.f32 %v157_v12, %v103_v13 }
  0xd6   :  { %v160_v15 = vpack.c.bf16 %v112_v14, %v112_v14 }
  0xd7   :  { %v104_v16 = vld [vmem:[#allocation2 + $0x8] sm:$0xff] }
  0xd8   :  { %133 = vrot.lane.b32.xlu1 %v160_v15, %s182_s0  ;;  %123 = vst.msk [vmem:[%s257_s3] sm:$0xf] %vm122_vm3, %v160_v15  ;;  %125 = vrot.lane.b32.xlu0 %v160_v15, %s183_s27  ;;  %v113_v17 = vadd.f32 %v157_v12, %v104_v16 }
  0xda   :  { %v161_v18 = vpack.c.bf16 %v113_v17, %v113_v17 }
  0xdc   :  { %135 = vrot.lane.b32.xlu1 %v161_v18, %s182_s0  ;;  %124 = vst.msk [vmem:[%s257_s3 + $0x4] sm:$0xf] %vm122_vm3, %v161_v18  ;;  %127 = vrot.lane.b32.xlu0 %v161_v18, %s183_s27 }
 0x14a   :  { %v134_v19 = vpop.permute.xlu1 %133  ;;  %v126_v20 = vpop.permute.xlu0 %125 }
 0x14b   :  { %139 = vst.msk [vmem:[%s258_s5] sm:$0xf] %vm122_vm3, %v134_v19  ;;  %131 = vst.msk [vmem:[%s259_s4] sm:$0xf] %vm122_vm3, %v126_v20 }
 0x14e   :  { %v136_v21 = vpop.permute.xlu1 %135  ;;  %v128_v22 = vpop.permute.xlu0 %127 }
 0x14f   :  { %140 = vst.msk [vmem:[%s258_s5 + $0x4] sm:$0xf] %vm122_vm3, %v136_v21  ;;  %132 = vst.msk [vmem:[%s259_s4 + $0x4] sm:$0xf] %vm122_vm3, %v128_v22 }

// kernel: self_attention_pallas.4
= control target key start
LH: loop header
LB: loop body
LE: loop exit
PB: predicated region body
PF: predicated region fallthrough
CT: control target
= control target key end

     0   :  { %s1237_s12 = smov 0   ;;  %s1239_s13 = smov 0   ;;  %s1418_s0 = inlined_call_operand.vmem [shape: bf16[2,8,32], index: 0, kind: input, shape index: {}]   ;;  %s1419_s1 = inlined_call_operand.vmem [shape: bf16[2,8,32], index: 1, kind: input, shape index: {}]   ;;  %s1420_s2 = inlined_call_operand.vmem [shape: bf16[2,8,32], index: 2, kind: input, shape index: {}]   ;;  %s1421_s3 = inlined_call_operand.vmem [shape: bf16[2,8,32], index: 3, kind: output, shape index: {}]  }
   0x1   :  { %s1241_s14 = smov 0  }
   0x2 LB: > { %s32_s15 = sadd.s32 1, %s1201_s13  ;;  %p1026_p0 = scmp.ge.s32.totalorder %s1205_s14, 1  ;;  %s1205_s14 = sphi %s1241_s14, %s13_s14   ;;  %s1201_s13 = sphi %s1239_s13, %s1423_s13   ;;  %s1197_s12 = sphi %s1237_s12, %s1422_s12  }
   0x3   : > { %p34_p1 = scmp.ge.s32.totalorder %s32_s15, 2  ;;  %p190_p2 = scmp.lt.s32.totalorder %s1205_s14, 3 }
   0x5   : > { %s1425_s15 = smov (%p34_p1, %s32_s15), 0  ;;  %p191_p3 = pnand %p1026_p0, %p190_p2 }
   0x6   : > { %p232_p4 = scmp.lt.s32.totalorder (!%p191_p3), %s1197_s12, 1  ;;  %s1211_s23 = smov (!%p191_p3), 120  }
   0x7   : > { %194 = sbr.rel (%p191_p3) target bundleno = 1410 (0x582), region = 32  ;;  %s1212_s24 = smov (!%p191_p3), 112  }
   0x8   : > { %s1213_s25 = smov (!%p191_p3), 104   ;;  %s1214_s29 = smov (!%p191_p3), 8  }
   0x9   : > { %s1215_s30 = smov (!%p191_p3), 16   ;;  %s1216_s4 = smov (!%p191_p3), 24  }
   0xc   : > { %vm274_vm0 = vcmask 64512   ;;  %v1207_v0 = vmov 0.0   ;;  %vm1208_vm1 = vmmov 0   ;;  %s1427_s12 = smov (!%p232_p4, %s1197_s12), 1  ;;  %vm265_vm2 = vcmask 7168  }
   0xd   : > { %1066 = vmatprep.subr.bf16.mxu0 %v1207_v0  ;;  %275 = vst.msk [vmem:[#allocation4] sm:$0xff] %vm274_vm0, %v1207_v0  ;;  %276 = vst.msk [vmem:[#allocation4 + $0x8] sm:$0xff] %vm274_vm0, %v1207_v0  ;;  %1068 = vmatprep.mubr.msk.bf16.mxu0 %vm1208_vm1, %v1207_v0  ;;  %s1269_s16 = sshll.u32 %s1427_s12, 2  ;;  %v1209_v4 = vmov -inf   ;;  %v1210_v10 = vmov 0   ;;  %vm364_vm3 = vcmask 1043456  }
   0xe   : > { %277 = vst.msk [vmem:[#allocation4 + $0x10] sm:$0xff] %vm274_vm0, %v1207_v0  ;;  %278 = vst.msk [vmem:[#allocation4 + $0x18] sm:$0xff] %vm274_vm0, %v1207_v0  ;;  %1072 = vmatprep.subr.bf16.mxu1 %v1207_v0  ;;  %1074 = vmatprep.mubr.msk.bf16.mxu1 %vm1208_vm1, %v1207_v0  ;;  %s1275_s19 = scalar_lea.vmem %s1419_s1, %s1269_s16  ;;  %s1282_s22 = scalar_lea.vmem %s1418_s0, %s1269_s16  ;;  %vm908_vm4 = vcmask 130048   ;;  %vm910_vm5 = vcmask 195584   ;;  %vm913_vm6 = vcmask 257024  }
   0xf   : > { %v280_v1 = vld [vmem:[%s1275_s19] sm:$0xf]  ;;  %266 = vst.msk [vmem:[#allocation2] sm:$0xff] %vm265_vm2, %v1209_v4  ;;  %267 = vst.msk [vmem:[#allocation2 + $0x8] sm:$0xff] %vm265_vm2, %v1209_v4  ;;  %1148 = vset.pattern.permute.xlu0 %v1210_v10  ;;  %1149 = vset.pattern.permute.xlu1 %v1210_v10  ;;  %s1329_s28 = scalar_lea.vmem %s1420_s2, %s1269_s16  ;;  %s259_s7 = scalar_lea.vmem %s1421_s3, %s1269_s16 }
  0x10   : > { %v287_v2 = vsel %vm274_vm0, %v280_v1, 0  ;;  %v279_v3 = vld [vmem:[%s1282_s22] sm:$0xf]  ;;  %268 = vst.msk [vmem:[#allocation2 + $0x10] sm:$0xff] %vm265_vm2, %v1209_v4  ;;  %269 = vst.msk [vmem:[#allocation2 + $0x18] sm:$0xff] %vm265_vm2, %v1209_v4 }
  0x11   : > { %1067 = vmatpush3.bf16.xpose.msra.mxu0 %v287_v2  ;;  %270 = vst.msk [vmem:[#allocation3] sm:$0xff] %vm265_vm2, %v1207_v0  ;;  %271 = vst.msk [vmem:[#allocation3 + $0x8] sm:$0xff] %vm265_vm2, %v1207_v0  ;;  %v1150_v11 = vld [vmem:[%s1275_s19] ss:$0 sps:$4 sm:$0xff]  }
  0x12   : > { %1084 = vmatprep.subr.bf16.mxu0 %v1207_v0  ;;  %272 = vst.msk [vmem:[#allocation3 + $0x10] sm:$0xff] %vm265_vm2, %v1207_v0  ;;  %273 = vst.msk [vmem:[#allocation3 + $0x18] sm:$0xff] %vm265_vm2, %v1207_v0  ;;  %422 = vrot.lane.b32.xlu1 %v1150_v11, %s1211_s23  ;;  %v1151_v12 = vld [vmem:[%s1282_s22] ss:$0 sps:$4 sm:$0xff]  }
  0x13   : > { %v1152_v13 = vld [vmem:[%s1275_s19] ss:$0 sps:$4 sm:$0xff]  }
  0x14   : > { %v1153_v14 = vld [vmem:[%s1282_s22] ss:$0 sps:$4 sm:$0xff]  }
  0x15   : > { %v1154_v15 = vld [vmem:[%s1275_s19] ss:$0 sps:$4 sm:$0xff]  }
  0x16   : > { %417 = vrot.lane.b32.xlu1 %v1151_v12, %s1211_s23  ;;  %v1155_v16 = vld [vmem:[%s1282_s22] ss:$0 sps:$4 sm:$0xff]   ;;  %v1358_v56 = vld [vmem:[#allocation2 + $0x8] sm:$0xff] }
  0x17   : > { %v1315_v17 = vld [vmem:[#allocation2] sm:$0xff]  ;;  %v1363_v60 = vld [vmem:[#allocation2 + $0x10] sm:$0xff]  ;;  %v765_v1 = vld [vmem:[#allocation2 + $0x18] sm:$0xff] }
  0x18   : > { %1069 = vmatmul.mubr.msk.bf16.vlgmr.msra.gmra.mxu0 %vm274_vm0, %v279_v3  ;;  %v281_v21 = vld [vmem:[%s1329_s28] sm:$0xf] }
  0x19   : > { %1086 = vmatprep.mubr.msk.bf16.mxu0 %vm1208_vm1, %v1207_v0  ;;  %v366_v22 = vsel %vm364_vm3, %v281_v21, 0 }
  0x1a   : > { %569 = vrot.lane.b32.xlu1 %v1152_v13, %s1212_s24  ;;  %1073 = vmatpush3.bf16.msra.mxu1 %v366_v22 }
  0x1b   : > { %1078 = vmatprep.subr.bf16.mxu1 %v1207_v0 }
  0x1e   : > { %564 = vrot.lane.b32.xlu1 %v1153_v14, %s1212_s24 }
  0x22   : > { %716 = vrot.lane.b32.xlu1 %v1154_v15, %s1213_s25 }
  0x26   : > { %711 = vrot.lane.b32.xlu1 %v1155_v16, %s1213_s25 }
  0x84   : > { %v423_v26 = vpop.permute.xlu1 %422 }
  0x85   : > { %v428_v29 = vsel %vm274_vm0, %v423_v26, 0 }
  0x88   : > { %v418_v27 = vpop.permute.xlu1 %417 }
  0x8c   : > { %v570_v31 = vpop.permute.xlu1 %569 }
  0x8d   : > { %v575_v33 = vsel %vm274_vm0, %v570_v31, 0 }
  0x90   : > { %v565_v32 = vpop.permute.xlu1 %564 }
  0x94   : > { %v717_v34 = vpop.permute.xlu1 %716 }
  0x95   : > { %v722_v35 = vsel %vm274_vm0, %v717_v34, 0 }
  0x98   : > { %v712_v36 = vpop.permute.xlu1 %711 }
  0xd8   : > { %v323_v5 = vpop.f32.mrf.mxu0 }
  0xd9   : > { %v330_v6 = vsel %vm274_vm0, %v323_v5, -inf }
  0xda   : > { %331 = vmax.xlane.f32.xlu0 %v330_v6  ;;  %v1070_v7 = vpop.f32.mrf.mxu0  ;;  %v1157_v6 = vld [vmem:[%s1329_s28] ss:$0 sps:$4 sm:$0xff]  }
  0xdb   : > { %v1158_v7 = vld [vmem:[%s1329_s28] ss:$0 sps:$4 sm:$0xff]  }
  0xdc   : > { %v326_v8 = vpop.f32.mrf.mxu0 }
  0xde   : > { %v1071_v9 = vpop.f32.mrf.mxu0 }
 0x163   : > { %v332_v18 = vpop.xlane.xlu0 %331 }
 0x164   : > { %v1318_v19 = vmax.f32 %v1315_v17, %v332_v18 }
 0x166   : > { %v334_v20 = vsub.f32 %v1315_v17, %v1318_v19  ;;  %410 = vst.msk [vmem:[#allocation2] sm:$0xff] %vm265_vm2, %v1318_v19  ;;  %339 = vperm.xlu0 %1148, %v1318_v19  }
 0x1e1   : > { %v340_v23 = vpop.permute.xlu0 %339 }
 0x1e2   : > { %v342_v24 = vsub.f32 %v323_v5, %v340_v23  ;;  %v1156_v5 = vld [vmem:[%s1329_s28] ss:$0 sps:$4 sm:$0xff]  }
 0x1e4   : > { %v343_v25 = vmul.f32 1.442695, %v342_v24 }
 0x1e6   : > { %1159 = vpow2.f32 %v343_v25 }
 0x1f3   : > { %v1334_v28 = vpop.eup %1159 }
 0x1f4   : > { %v360_v30 = vpack.c.bf16 %v1334_v28, %v1334_v28  ;;  %v347_v8 = vsel %vm274_vm0, %v1334_v28, 0.0 }
 0x1f6   : > { %1075 = vmatmul.mubr.msk.bf16.vlgmr.msra.gmra.mxu1 %vm274_vm0, %v360_v30 }
 0x1f7   : > { %1079 = vmatpush3.bf16.xpose.msra.mxu1 %v428_v29  ;;  %1080 = vmatprep.mubr.msk.bf16.mxu1 %vm1208_vm1, %v1207_v0 }
 0x1f8   : > { %1090 = vmatprep.subr.bf16.mxu1 %v1207_v0 }
 0x1fe   : > { %1081 = vmatmul.mubr.msk.bf16.vlgmr.msra.gmra.mxu1 %vm274_vm0, %v418_v27 }
 0x1ff   : > { %1091 = vmatpush3.bf16.xpose.msra.mxu1 %v575_v33  ;;  %1092 = vmatprep.mubr.msk.bf16.mxu1 %vm1208_vm1, %v1207_v0  ;;  %v335_v33 = vmul.f32 1.442695, %v334_v20 }
 0x200   : > { %1102 = vmatprep.subr.bf16.mxu1 %v1207_v0 }
 0x206   : > { %1093 = vmatmul.mubr.msk.bf16.vlgmr.msra.gmra.mxu1 %vm274_vm0, %v565_v32 }
 0x207   : > { %1103 = vmatpush3.bf16.xpose.msra.mxu1 %v722_v35  ;;  %1104 = vmatprep.mubr.msk.bf16.mxu1 %vm1208_vm1, %v1207_v0 }
 0x20e   : > { %1105 = vmatmul.mubr.msk.bf16.vlgmr.msra.gmra.mxu1 %vm274_vm0, %v712_v36 }
 0x2b6   : > { %v1353_v37 = vpop.f32.mrf.mxu1 }
 0x2b8   : > { %v1076_v38 = vpop.f32.mrf.mxu1 }
 0x2ba   : > { %v405_v39 = vpop.f32.mrf.mxu1 }
 0x2bc   : > { %v1077_v40 = vpop.f32.mrf.mxu1 }
 0x2be   : > { %v464_v41 = vpop.f32.mrf.mxu1 }
 0x2bf   : > { %v472_v42 = vsel %vm274_vm0, %v464_v41, -inf }
 0x2c0   : > { %473 = vmax.xlane.f32.xlu1 %v472_v42  ;;  %v1082_v43 = vpop.f32.mrf.mxu1 }
 0x2c2   : > { %v467_v44 = vpop.f32.mrf.mxu1 }
 0x2c4   : > { %v1083_v45 = vpop.f32.mrf.mxu1 }
 0x2c6   : > { %v611_v46 = vpop.f32.mrf.mxu1 }
 0x2c7   : > { %v619_v47 = vsel %vm274_vm0, %v611_v46, -inf }
 0x2c8   : > { %620 = vmax.xlane.f32.xlu0 %v619_v47  ;;  %v1094_v48 = vpop.f32.mrf.mxu1  ;;  %v488_v47 = vld [vmem:[#allocation3 + $0x8] sm:$0xff] }
 0x2ca   : > { %v614_v49 = vpop.f32.mrf.mxu1 }
 0x2cc   : > { %v1095_v50 = vpop.f32.mrf.mxu1 }
 0x2ce   : > { %v758_v51 = vpop.f32.mrf.mxu1 }
 0x2cf   : > { %v766_v52 = vsel %vm274_vm0, %v758_v51, -inf }
 0x2d0   : > { %767 = vmax.xlane.f32.xlu1 %v766_v52  ;;  %v1106_v53 = vpop.f32.mrf.mxu1 }
 0x2d2   : > { %v761_v54 = vpop.f32.mrf.mxu1 }
 0x2d4   : > { %v1107_v55 = vpop.f32.mrf.mxu1 }
 0x349   : > { %v474_v57 = vpop.xlane.xlu1 %473 }
 0x34a   : > { %v475_v58 = vmax.f32 %v1358_v56, %v474_v57  ;;  %v353_v57 = vld [vmem:[#allocation4] sm:$0xff] }
 0x34c   : > { %v476_v59 = vsub.f32 %v1358_v56, %v475_v58  ;;  %557 = vst.msk [vmem:[#allocation2 + $0x8] sm:$0xff] %vm265_vm2, %v475_v58  ;;  %481 = vperm.xlu1 %1149, %v475_v58   ;;  %v782_v56 = vld [vmem:[#allocation3 + $0x18] sm:$0xff] }
 0x34e   : > { %v477_v35 = vmul.f32 1.442695, %v476_v59 }
 0x351   : > { %v621_v61 = vpop.xlane.xlu0 %620 }
 0x352   : > { %v622_v62 = vmax.f32 %v1363_v60, %v621_v61 }
 0x354   : > { %v623_v63 = vsub.f32 %v1363_v60, %v622_v62  ;;  %704 = vst.msk [vmem:[#allocation2 + $0x10] sm:$0xff] %vm265_vm2, %v622_v62  ;;  %628 = vperm.xlu0 %1148, %v622_v62  }
 0x356   : > { %v624_v39 = vmul.f32 1.442695, %v623_v63 }
 0x359   : > { %v768_v2 = vpop.xlane.xlu1 %767 }
 0x35a   : > { %v769_v3 = vmax.f32 %v765_v1, %v768_v2 }
 0x35c   : > { %v770_v4 = vsub.f32 %v765_v1, %v769_v3  ;;  %851 = vst.msk [vmem:[#allocation2 + $0x18] sm:$0xff] %vm265_vm2, %v769_v3  ;;  %775 = vperm.xlu1 %1149, %v769_v3  }
 0x35e   : > { %v771_v38 = vmul.f32 1.442695, %v770_v4 }
 0x360   : > { %507 = vrot.lane.b32.xlu1 %v1156_v5, %s1211_s23 }
 0x364   : > { %654 = vrot.lane.b32.xlu1 %v1157_v6, %s1212_s24  ;;  %v496_v6 = vld [vmem:[#allocation4 + $0x8] sm:$0xff] }
 0x368   : > { %801 = vrot.lane.b32.xlu1 %v1158_v7, %s1213_s25 }
 0x38c   : > { %348 = vadd.xlane.f32.xlu1 %v347_v8 }
 0x3c7   : > { %v482_v9 = vpop.permute.xlu1 %481 }
 0x3c8   : > { %v484_v10 = vsub.f32 %v464_v41, %v482_v9  ;;  %v345_v41 = vld [vmem:[#allocation3] sm:$0xff] }
 0x3ca   : > { %v485_v11 = vmul.f32 1.442695, %v484_v10 }
 0x3cc   : > { %1161 = vpow2.f32 %v485_v11 }
 0x3cf   : > { %v629_v12 = vpop.permute.xlu0 %628 }
 0x3d0   : > { %v631_v13 = vsub.f32 %v611_v46, %v629_v12 }
 0x3d2   : > { %v632_v14 = vmul.f32 1.442695, %v631_v13 }
 0x3d4   : > { %1163 = vpow2.f32 %v632_v14 }
 0x3d7   : > { %v776_v15 = vpop.permute.xlu1 %775 }
 0x3d8   : > { %v778_v16 = vsub.f32 %v758_v51, %v776_v15  ;;  %v635_v51 = vld [vmem:[#allocation3 + $0x10] sm:$0xff] }
 0x3d9   : > { %v1162_v18 = vpop.eup %1161 }
 0x3da   : > { %v779_v21 = vmul.f32 1.442695, %v778_v16  ;;  %v490_v22 = vsel %vm274_vm0, %v1162_v18, 0.0  ;;  %v503_v25 = vpack.c.bf16 %v1162_v18, %v1162_v18 }
 0x3db   : > { %491 = vadd.xlane.f32.xlu0 %v490_v22  ;;  %v508_v23 = vpop.permute.xlu1 %507  ;;  %v790_v22 = vld [vmem:[#allocation4 + $0x18] sm:$0xff] }
 0x3dc   : > { %1165 = vpow2.f32 %v779_v21  ;;  %v513_v24 = vsel %vm364_vm3, %v508_v23, 0 }
 0x3dd   : > { %1085 = vmatpush3.bf16.msra.mxu0 %v513_v24  ;;  %1167 = vpow2.f32 %v335_v33 }
 0x3de   : > { %1096 = vmatprep.subr.bf16.mxu0 %v1207_v0  ;;  %1169 = vpow2.f32 %v477_v35 }
 0x3df   : > { %v655_v26 = vpop.permute.xlu1 %654  ;;  %1171 = vpow2.f32 %v771_v38 }
 0x3e0   : > { %1087 = vmatmul.mubr.msk.bf16.vlgmr.msra.gmra.mxu0 %vm274_vm0, %v503_v25  ;;  %v660_v27 = vsel %vm364_vm3, %v655_v26, 0  ;;  %1173 = vpow2.f32 %v624_v39 }
 0x3e1   : > { %v1164_v28 = vpop.eup %1163  ;;  %1097 = vmatpush3.bf16.msra.mxu0 %v660_v27  ;;  %1098 = vmatprep.mubr.msk.bf16.mxu0 %vm1208_vm1, %v1207_v0 }
 0x3e2   : > { %v637_v29 = vsel %vm274_vm0, %v1164_v28, 0.0  ;;  %1108 = vmatprep.subr.bf16.mxu0 %v1207_v0  ;;  %v650_v31 = vpack.c.bf16 %v1164_v28, %v1164_v28 }
 0x3e3   : > { %638 = vadd.xlane.f32.xlu0 %v637_v29  ;;  %v802_v30 = vpop.permute.xlu1 %801 }
 0x3e4   : > { %v807_v32 = vsel %vm364_vm3, %v802_v30, 0 }
 0x3e8   : > { %1099 = vmatmul.mubr.msk.bf16.vlgmr.msra.gmra.mxu0 %vm274_vm0, %v650_v31 }
 0x3e9   : > { %v1166_v34 = vpop.eup %1165  ;;  %1109 = vmatpush3.bf16.msra.mxu0 %v807_v32  ;;  %1110 = vmatprep.mubr.msk.bf16.mxu0 %vm1208_vm1, %v1207_v0 }
 0x3ea   : > { %v784_v36 = vsel %vm274_vm0, %v1166_v34, 0.0  ;;  %v797_v40 = vpack.c.bf16 %v1166_v34, %v1166_v34  ;;  %v1168_v17 = vpop.eup %1167 }
 0x3eb   : > { %785 = vadd.xlane.f32.xlu1 %v784_v36  ;;  %v1170_v19 = vpop.eup %1169  ;;  %v346_v42 = vmul.f32 %v1168_v17, %v345_v41 }
 0x3ec   : > { %v1172_v20 = vpop.eup %1171  ;;  %v489_v48 = vmul.f32 %v1170_v19, %v488_v47 }
 0x3ed   : > { %v1174_v0 = vpop.eup %1173  ;;  %v783_v58 = vmul.f32 %v1172_v20, %v782_v56 }
 0x3ee   : > { %v636_v52 = vmul.f32 %v1174_v0, %v635_v51 }
 0x3f0   : > { %1111 = vmatmul.mubr.msk.bf16.vlgmr.msra.gmra.mxu0 %vm274_vm0, %v797_v40 }
 0x3f9   : > { %356 = vperm.xlu0 %1148, %v1168_v17  }
 0x3fc   : > { %499 = vperm.xlu1 %1149, %v1170_v19  }
 0x3fd   : > { %793 = vperm.xlu0 %1148, %v1172_v20  }
 0x400   : > { %646 = vperm.xlu1 %1149, %v1174_v0  }
 0x415   : > { %v349_v43 = vpop.xlane.xlu1 %348 }
 0x416   : > { %v350_v44 = vadd.f32 %v349_v43, %v346_v42 }
 0x418   : > { %352 = vst.msk [vmem:[#allocation3] sm:$0xff] %vm265_vm2, %v350_v44 }
 0x41f   : > { %v855_v45 = vld [vmem:[#allocation3] sm:$0xff] }
 0x420   : > { %1175 = vrcp.f32 %v855_v45 }
 0x42d   : > { %v1176_v46 = vpop.eup %1175 }
 0x42e   : > { %861 = vperm.xlu1 %1149, %v1176_v46  }
 0x464   : > { %v492_v49 = vpop.xlane.xlu0 %491 }
 0x465   : > { %v493_v50 = vadd.f32 %v492_v49, %v489_v48 }
 0x467   : > { %494 = vst.msk [vmem:[#allocation3 + $0x8] sm:$0xff] %vm265_vm2, %v493_v50 }
 0x46c   : > { %v639_v53 = vpop.xlane.xlu0 %638 }
 0x46d   : > { %v640_v54 = vadd.f32 %v639_v53, %v636_v52 }
 0x46e   : > { %v865_v55 = vld [vmem:[#allocation3 + $0x8] sm:$0xff] }
 0x46f   : > { %641 = vst.msk [vmem:[#allocation3 + $0x10] sm:$0xff] %vm265_vm2, %v640_v54  ;;  %1177 = vrcp.f32 %v865_v55 }
 0x474   : > { %v786_v59 = vpop.xlane.xlu1 %785  ;;  %v357_v60 = vpop.permute.xlu0 %356 }
 0x475   : > { %v787_v61 = vadd.f32 %v786_v59, %v783_v58  ;;  %v359_v62 = vmul.f32 %v357_v60, %v353_v57 }
 0x476   : > { %v875_v63 = vld [vmem:[#allocation3 + $0x10] sm:$0xff] }
 0x477   : > { %788 = vst.msk [vmem:[#allocation3 + $0x18] sm:$0xff] %vm265_vm2, %v787_v61  ;;  %v408_v1 = vadd.f32 %v1353_v37, %v359_v62  ;;  %1179 = vrcp.f32 %v875_v63  ;;  %v643_v37 = vld [vmem:[#allocation4 + $0x10] sm:$0xff] }
 0x478   : > { %v500_v7 = vpop.permute.xlu1 %499  ;;  %v794_v23 = vpop.permute.xlu0 %793 }
 0x479   : > { %409 = vst.msk [vmem:[#allocation4] sm:$0xff] %vm274_vm0, %v408_v1  ;;  %v502_v8 = vmul.f32 %v500_v7, %v496_v6  ;;  %v796_v26 = vmul.f32 %v794_v23, %v790_v22 }
 0x47c   : > { %v1178_v2 = vpop.eup %1177  ;;  %v647_v12 = vpop.permute.xlu1 %646 }
 0x47d   : > { %871 = vperm.xlu0 %1148, %v1178_v2   ;;  %v649_v15 = vmul.f32 %v647_v12, %v643_v37 }
 0x47e   : > { %v885_v3 = vld [vmem:[#allocation3 + $0x18] sm:$0xff] }
 0x47f   : > { %1181 = vrcp.f32 %v885_v3 }
 0x480   : > { %v858_v20 = vld [vmem:[#allocation4] sm:$0xff] }
 0x484   : > { %v1180_v4 = vpop.eup %1179 }
 0x485   : > { %881 = vperm.xlu1 %1149, %v1180_v4  }
 0x48c   : > { %v1182_v5 = vpop.eup %1181 }
 0x48d   : > { %891 = vperm.xlu0 %1148, %v1182_v5  }
 0x4a0   : > { %v549_v9 = vpop.f32.mrf.mxu0 }
 0x4a1   : > { %v555_v10 = vadd.f32 %v549_v9, %v502_v8 }
 0x4a2   : > { %v1088_v11 = vpop.f32.mrf.mxu0 }
 0x4a3   : > { %556 = vst.msk [vmem:[#allocation4 + $0x8] sm:$0xff] %vm274_vm0, %v555_v10 }
 0x4a4   : > { %v552_v13 = vpop.f32.mrf.mxu0 }
 0x4a6   : > { %v1089_v14 = vpop.f32.mrf.mxu0 }
 0x4a8   : > { %v696_v16 = vpop.f32.mrf.mxu0 }
 0x4a9   : > { %v702_v18 = vadd.f32 %v696_v16, %v649_v15  ;;  %v862_v35 = vpop.permute.xlu1 %861 }
 0x4aa   : > { %v1100_v21 = vpop.f32.mrf.mxu0  ;;  %v868_v33 = vld [vmem:[#allocation4 + $0x8] sm:$0xff]  ;;  %v864_v41 = vmul.f32 %v862_v35, %v858_v20 }
 0x4ab   : > { %703 = vst.msk [vmem:[#allocation4 + $0x10] sm:$0xff] %vm274_vm0, %v702_v18 }
 0x4ac   : > { %v699_v24 = vpop.f32.mrf.mxu0 }
 0x4ae   : > { %v1101_v25 = vpop.f32.mrf.mxu0 }
 0x4b0   : > { %v843_v27 = vpop.f32.mrf.mxu0 }
 0x4b1   : > { %v849_v28 = vadd.f32 %v843_v27, %v796_v26 }
 0x4b2   : > { %v1112_v29 = vpop.f32.mrf.mxu0  ;;  %v878_v38 = vld [vmem:[#allocation4 + $0x10] sm:$0xff] }
 0x4b3   : > { %850 = vst.msk [vmem:[#allocation4 + $0x18] sm:$0xff] %vm274_vm0, %v849_v28 }
 0x4b4   : > { %v846_v30 = vpop.f32.mrf.mxu0 }
 0x4b6   : > { %v1113_v31 = vpop.f32.mrf.mxu0 }
 0x4ba   : > { %v888_v17 = vld [vmem:[#allocation4 + $0x18] sm:$0xff] }
 0x4f8   : > { %v872_v32 = vpop.permute.xlu0 %871 }
 0x4f9   : > { %v874_v34 = vmul.f32 %v872_v32, %v868_v33 }
 0x4fb   : > { %896 = vrot.lane.b32.xlu1 %v874_v34, %s1214_s29 }
 0x500   : > { %v882_v36 = vpop.permute.xlu1 %881 }
 0x501   : > { %v884_v39 = vmul.f32 %v882_v36, %v878_v38 }
 0x503   : > { %900 = vrot.lane.b32.xlu0 %v884_v39, %s1215_s30 }
 0x508   : > { %v892_v40 = vpop.permute.xlu0 %891 }
 0x509   : > { %v894_v19 = vmul.f32 %v892_v40, %v888_v17 }
 0x50b   : > { %904 = vrot.lane.b32.xlu1 %v894_v19, %s1216_s4 }
 0x56d   : > { %v897_v0 = vpop.permute.xlu1 %896 }
 0x56e   : > { %v907_v43 = vsel %vm274_vm0, %v864_v41, %v897_v0 }
 0x575   : > { %v901_v42 = vpop.permute.xlu0 %900 }
 0x576   : > { %v909_v44 = vsel %vm908_vm4, %v907_v43, %v901_v42 }
 0x57d   : > { %v905_v45 = vpop.permute.xlu1 %904 }
 0x57e   : > { %v911_v46 = vsel %vm910_vm5, %v909_v44, %v905_v45 }
 0x57f   : > { %v912_v47 = vpack.c.bf16 %v911_v46, %v911_v46 }
 0x581   : > { %914 = vst.msk [vmem:[%s259_s7] sm:$0xf] %vm913_vm6, %v912_v47 }
 0x582 PF: > { %s13_s14 = sadd.s32 1, %s1205_s14   ;;  %s1422_s12 = smov %s1201_s13 }
 0x583   : > { %p10_p5 = scmp.ge.s32.totalorder %s13_s14, 4   ;;  %s1423_s13 = smov %s1425_s15 }
 0x585   :  { %12 = sbr.rel (!%p10_p5) target bundleno = 2 (0x2), region = 85 }

</bundles_post_ra>
